<compile_context>
chip_gen: v6e
topology: v6e:2x2x1
jax: 0.10.0
libtpu: 0.0.40
codegen_flags: <defaults>
</compile_context>

<pallas_src>
import functools

import jax
import jax.numpy as jnp
from jax import lax
from jax.experimental import pallas as pl
from jax.experimental.pallas import tpu as pltpu


def _round_up(x, m):
    return ((x + m - 1) // m) * m


def _conloss_kernel(lhs_ref, rhs_ref, out_ref, m_ref, l_ref, psum_ref, *,
                    tr, tc, n, n_pad, bsz, n_views, pos_count):
    # lhs_ref : (TR, Dp) bf16 anchor rows for this row tile (held across j)
    # rhs_ref : (TC, Dp) bf16 contrast rows for this column tile (streamed)
    # out_ref : (TR, 1)  f32 per-row sum of log-prob over positive columns
    # scratch : (TR, 1)  f32 running max / running exp-denominator / pos-sum
    i = pl.program_id(0)          # anchor-row tile   (parallel)
    j = pl.program_id(1)          # contrast-col tile (reduction, innermost)

    @pl.when(j == 0)
    def _init():
        m_ref[...] = jnp.full(m_ref.shape, -jnp.inf, dtype=jnp.float32)
        l_ref[...] = jnp.zeros(l_ref.shape, dtype=jnp.float32)
        psum_ref[...] = jnp.zeros(psum_ref.shape, dtype=jnp.float32)

    # (TR, TC) similarity tile on the MXU (bf16 x bf16 -> f32 accumulate).
    # 1/T is already folded into both operands in the wrapper, so no per-tile
    # scale.  Contracting the last dim of both operands is the standard Q.K^T
    # form (same as the flash-attention reference kernels).
    sim = lax.dot_general(
        lhs_ref[...], rhs_ref[...],
        dimension_numbers=(((1,), (1,)), ((), ())),
        preferred_element_type=jnp.float32,
    )

    # Index arithmetic replaces the [N, N] masks of the reference:
    #   diff = col_global - row_global.
    row_l = lax.broadcasted_iota(jnp.int32, (tr, tc), 0)
    col_l = lax.broadcasted_iota(jnp.int32, (tr, tc), 1)
    diff = (col_l - row_l) + (j * tc - i * tr)

    # Positive mask of the default path: same sample index, different view
    # (col == row +/- k*bsz, k = 1..n_views-1).  False positives that land on
    # zero-padded columns contribute sim == 0, so no column-validity test.
    if n_views <= 1:
        same = jnp.zeros((tr, tc), dtype=jnp.bool_)
    elif n_views <= 3:
        same = (diff == bsz) | (diff == -bsz)
        for k in range(2, n_views):          # compile-time unrolled
            same = same | (diff == k * bsz) | (diff == -k * bsz)
    else:
        # constant-cost form for many views
        same = jnp.logical_and(diff % bsz == 0, diff != 0)

    # Positives accumulate the *raw* (un-shifted) logits.
    psum_ref[...] += jnp.sum(jnp.where(same, sim, 0.0), axis=1, keepdims=True)

    # Online softmax denominator over non-self (and non-padded) columns.
    if n != n_pad:
        invalid = jnp.logical_or(diff == 0, (col_l + j * tc) >= n)
    else:
        invalid = diff == 0
    sim_d = jnp.where(invalid, -jnp.inf, sim)

    tile_max = jnp.max(sim_d, axis=1, keepdims=True)
    m_new = jnp.maximum(m_ref[...], tile_max)
    alpha = jnp.exp(m_ref[...] - m_new)
    l_ref[...] = alpha * l_ref[...] + jnp.sum(jnp.exp(sim_d - m_new),
                                              axis=1, keepdims=True)
    m_ref[...] = m_new

    @pl.when(j == pl.num_programs(1) - 1)
    def _finalize():
        # sum_pos(log_prob) = sum_pos(sim) - n_pos * log(sum_{c != r} exp(sim_c))
        log_denom = m_ref[...] + jnp.log(l_ref[...])
        per_row = psum_ref[...] - jnp.float32(pos_count) * log_denom
        if n != n_pad:
            # zero padded anchor rows so the wrapper can do a plain full sum
            row_g = i * tr + lax.broadcasted_iota(jnp.int32, (tr, 1), 0)
            per_row = jnp.where(row_g < n, per_row, 0.0)
        out_ref[...] = per_row


def conloss_pallas(features, temperature=0.07, base_temperature=0.07):
    """features: [bsz, n_views, ...] float. Returns scalar mean loss (default path)."""
    if features.ndim < 3:
        raise ValueError('`features` needs to be [bsz, n_views, ...]')
    if features.ndim > 3:
        features = features.reshape(features.shape[0], features.shape[1], -1)
    bsz, n_views, d = features.shape
    n = bsz * n_views

    # contrast_feature = torch.cat(torch.unbind(features, dim=1), dim=0): view-major rows.
    cf = jnp.swapaxes(features, 0, 1).reshape(n, d).astype(jnp.float32)
    # Fold 1/temperature into the Gram matrix once (sqrt per operand): replaces
    # an N^2 VPU multiply inside the kernel with a single N*D multiply in XLA.
    cf = cf * jnp.float32(float(1.0 / temperature) ** 0.5)

    # Tile sizes: 256 fills the 256x256 MXU on v6e/v7x (and only costs grid-step
    # overhead on v5e's 128x128 MXU); fall back to 128 for tiny batches.
    tile = 128 if n <= 128 else 256
    tr = tc = tile
    n_pad = _round_up(n, tile)
    d_pad = _round_up(d, 128)

    cf = jnp.pad(cf, ((0, n_pad - n), (0, d_pad - d)))
    cf_bf16 = cf.astype(jnp.bfloat16)      # halves DMA traffic; MXU-native dtype

    pos_count = n_views - 1
    kernel = functools.partial(
        _conloss_kernel, tr=tr, tc=tc, n=n, n_pad=n_pad,
        bsz=bsz, n_views=n_views, pos_count=pos_count,
    )

    num_i = n_pad // tr
    num_j = n_pad // tc

    # Budget VMEM against the actual generation (64 MiB/TC on v7x, 128 MiB on
    # v5e/v6e); the column-tiled kernel needs far less, this is just headroom.
    try:
        vmem_cap = int(pltpu.get_tpu_info().vmem_capacity_bytes)
    except Exception:
        vmem_cap = 64 * 1024 * 1024
    vmem_limit = min(vmem_cap * 3 // 4, 100 * 1024 * 1024)

    cost = pl.CostEstimate(
        flops=2 * n_pad * n_pad * d_pad,
        transcendentals=n_pad * n_pad,
        # lhs stream reads the matrix once total (block index constant over j);
        # rhs stream re-reads it once per row tile.
        bytes_accessed=(n_pad * d_pad * 2) + num_i * (n_pad * d_pad * 2) + n_pad * 4,
    )

    per_row = pl.pallas_call(
        kernel,
        out_shape=jax.ShapeDtypeStruct((n_pad, 1), jnp.float32),
        grid=(num_i, num_j),
        in_specs=[
            pl.BlockSpec((tr, d_pad), lambda i, j: (i, 0)),   # anchor rows (held over j)
            pl.BlockSpec((tc, d_pad), lambda i, j: (j, 0)),   # contrast cols (streamed)
        ],
        out_specs=pl.BlockSpec((tr, 1), lambda i, j: (i, 0)),
        scratch_shapes=[
            pltpu.VMEM((tr, 1), jnp.float32),   # running row max
            pltpu.VMEM((tr, 1), jnp.float32),   # running exp denominator
            pltpu.VMEM((tr, 1), jnp.float32),   # running positive-logit sum
        ],
        compiler_params=pltpu.CompilerParams(
            dimension_semantics=("parallel", "arbitrary"),
            vmem_limit_bytes=int(vmem_limit),
        ),
        cost_estimate=cost,
    )(cf_bf16, cf_bf16)

    if pos_count == 0:
        scale = jnp.float32(jnp.nan)   # matches PyTorch 0/0 -> NaN when n_views == 1
    else:
        scale = jnp.float32(-(temperature / base_temperature) / (pos_count * n))
    # Padded rows were zeroed inside the kernel, so a full sum is safe.
    return scale * jnp.sum(per_row)


def conloss_ref(features, temperature=0.07, base_temperature=0.07):
    """Pure-JAX f32 reference mirroring the PyTorch forward (default args)."""
    bsz, n_views, d = features.shape
    n = bsz * n_views
    cf = jnp.swapaxes(features, 0, 1).reshape(n, d)
    sim = jnp.matmul(cf, cf.T) / temperature
    logits = sim - jnp.max(sim, axis=1, keepdims=True)
    logits_mask = 1.0 - jnp.eye(n, dtype=jnp.float32)
    mask = jnp.tile(jnp.eye(bsz, dtype=jnp.float32), (n_views, n_views)) * logits_mask
    exp_logits = jnp.exp(logits) * logits_mask
    log_prob = logits - jnp.log(jnp.sum(exp_logits, axis=1, keepdims=True))
    mean_log_prob_pos = jnp.sum(mask * log_prob, axis=1) / jnp.sum(mask, axis=1)
    loss = -(temperature / base_temperature) * mean_log_prob_pos
    return jnp.mean(loss)


if __name__ == "__main__":
    # Small deterministic example: bsz=8, n_views=2, feature dim=32.
    key = jax.random.PRNGKey(0)
    bsz, n_views, dim = 8, 2, 32
    feats = jax.random.normal(key, (bsz, n_views, dim), dtype=jnp.float32)
    # L2-normalize per feature vector, as is typical for contrastive features.
    feats = feats / jnp.linalg.norm(feats, axis=-1, keepdims=True)

    loss = jax.block_until_ready(conloss_pallas(feats))
    ref = jax.block_until_ready(conloss_ref(feats))

    # bf16 MXU operands (f32 accumulation) -> tolerance loosened vs pure-f32 ref.
    assert jnp.allclose(loss, ref, rtol=2e-2, atol=2e-2), (loss, ref)

    print("KERNEL_OK")
</pallas_src>

<mosaic_0001>
module attributes {stable_mosaic.version = 11 : i64} {
  func.func @_conloss_kernel(%arg0: i32, %arg1: i32, %arg2: memref<128x128xbf16, #tpu.memory_space<vmem>>, %arg3: memref<128x128xbf16, #tpu.memory_space<vmem>>, %arg4: memref<128x1xf32, #tpu.memory_space<vmem>>, %arg5: memref<128x1xf32, #tpu.memory_space<vmem>>, %arg6: memref<128x1xf32, #tpu.memory_space<vmem>>, %arg7: memref<128x1xf32, #tpu.memory_space<vmem>>) attributes {dimension_semantics = [#tpu.dimension_semantics<parallel>, #tpu.dimension_semantics<arbitrary>], iteration_bounds = array<i64: 1, 1>, scalar_prefetch = 0 : i64, scratch_operands = 3 : i64, tpu.core_type = #tpu.core_type<tc>, window_params = [{transform_indices = @transform_0, window_bounds = array<i64: 128, 128>}, {transform_indices = @transform_1, window_bounds = array<i64: 128, 128>}, {transform_indices = @transform_2, window_bounds = array<i64: 128, 1>}]} {
    %c0_i32 = arith.constant 0 : i32
    %0 = arith.cmpi eq, %arg1, %c0_i32 : i32
    %1 = arith.extui %0 : i1 to i32
    %c0_i32_0 = arith.constant 0 : i32
    %2 = arith.cmpi ne, %1, %c0_i32_0 : i32
    scf.if %2 {
      %cst_28 = arith.constant 0xFF800000 : f32
      %56 = vector.broadcast %cst_28 : f32 to vector<128x1xf32>
      %c0_29 = arith.constant 0 : index
      %c0_30 = arith.constant 0 : index
      %57 = vector.load %arg5[%c0_29, %c0_30] : memref<128x1xf32, #tpu.memory_space<vmem>>, vector<128x1xf32>
      tpu.vector_store %arg5[%c0_29, %c0_30], %56 {strides = array<i32>} : memref<128x1xf32, #tpu.memory_space<vmem>>, vector<128x1xf32>,
      %cst_31 = arith.constant 0.000000e+00 : f32
      %58 = vector.broadcast %cst_31 : f32 to vector<128x1xf32>
      %c0_32 = arith.constant 0 : index
      %c0_33 = arith.constant 0 : index
      %59 = vector.load %arg6[%c0_32, %c0_33] : memref<128x1xf32, #tpu.memory_space<vmem>>, vector<128x1xf32>
      tpu.vector_store %arg6[%c0_32, %c0_33], %58 {strides = array<i32>} : memref<128x1xf32, #tpu.memory_space<vmem>>, vector<128x1xf32>,
      %cst_34 = arith.constant 0.000000e+00 : f32
      %60 = vector.broadcast %cst_34 : f32 to vector<128x1xf32>
      %c0_35 = arith.constant 0 : index
      %c0_36 = arith.constant 0 : index
      %61 = vector.load %arg7[%c0_35, %c0_36] : memref<128x1xf32, #tpu.memory_space<vmem>>, vector<128x1xf32>
      tpu.vector_store %arg7[%c0_35, %c0_36], %60 {strides = array<i32>} : memref<128x1xf32, #tpu.memory_space<vmem>>, vector<128x1xf32>,
    } else {
    }
    %c0 = arith.constant 0 : index
    %c0_1 = arith.constant 0 : index
    %3 = vector.load %arg2[%c0, %c0_1] : memref<128x128xbf16, #tpu.memory_space<vmem>>, vector<128x128xbf16>
    %c0_2 = arith.constant 0 : index
    %c0_3 = arith.constant 0 : index
    %4 = vector.load %arg3[%c0_2, %c0_3] : memref<128x128xbf16, #tpu.memory_space<vmem>>, vector<128x128xbf16>
    %cst = arith.constant dense<0.000000e+00> : vector<128x128xf32>
    %5 = tpu.matmul %3, %4, %cst {dimension_numbers = #tpu.dot_dimension_numbers<[1], [1], [0], [0], [0, 0, 1, 0], [], []>} : vector<128x128xbf16>, vector<128x128xbf16>, vector<128x128xf32> -> vector<128x128xf32>
    %6 = tpu.iota {dimensions = array<i32: 0>} : vector<128x128xi32>
    %7 = tpu.iota {dimensions = array<i32: 1>} : vector<128x128xi32>
    %8 = arith.subi %7, %6 : vector<128x128xi32>
    %c128_i32 = arith.constant 128 : i32
    %9 = arith.muli %arg1, %c128_i32 : i32
    %c128_i32_4 = arith.constant 128 : i32
    %10 = arith.muli %arg0, %c128_i32_4 : i32
    %11 = arith.subi %9, %10 : i32
    %12 = vector.broadcast %11 : i32 to vector<128x128xi32>
    %13 = arith.addi %8, %12 : vector<128x128xi32>
    %c8_i32 = arith.constant 8 : i32
    %14 = vector.broadcast %c8_i32 : i32 to vector<128x128xi32>
    %15 = arith.cmpi eq, %13, %14 : vector<128x128xi32>
    %c-8_i32 = arith.constant -8 : i32
    %16 = vector.broadcast %c-8_i32 : i32 to vector<128x128xi32>
    %17 = arith.cmpi eq, %13, %16 : vector<128x128xi32>
    %18 = arith.ori %15, %17 : vector<128x128xi1>
    %c0_5 = arith.constant 0 : index
    %c0_6 = arith.constant 0 : index
    %19 = vector.load %arg7[%c0_5, %c0_6] : memref<128x1xf32, #tpu.memory_space<vmem>>, vector<128x1xf32>
    %cst_7 = arith.constant 0.000000e+00 : f32
    %20 = vector.broadcast %cst_7 : f32 to vector<128x128xf32>
    %21 = arith.select %18, %5, %20 : vector<128x128xi1>, vector<128x128xf32>
    %cst_8 = arith.constant dense<0.000000e+00> : vector<128xf32>
    %22 = vector.multi_reduction <add>, %21, %cst_8 [1] : vector<128x128xf32> to vector<128xf32>
    %23 = vector.shape_cast %22 : vector<128xf32> to vector<128x1xf32>
    %24 = arith.addf %19, %23 : vector<128x1xf32>
    %c0_9 = arith.constant 0 : index
    %c0_10 = arith.constant 0 : index
    %25 = vector.load %arg7[%c0_9, %c0_10] : memref<128x1xf32, #tpu.memory_space<vmem>>, vector<128x1xf32>
    tpu.vector_store %arg7[%c0_9, %c0_10], %24 {strides = array<i32>} : memref<128x1xf32, #tpu.memory_space<vmem>>, vector<128x1xf32>,
    %c0_i32_11 = arith.constant 0 : i32
    %26 = vector.broadcast %c0_i32_11 : i32 to vector<128x128xi32>
    %27 = arith.cmpi eq, %13, %26 : vector<128x128xi32>
    %c128_i32_12 = arith.constant 128 : i32
    %28 = arith.muli %arg1, %c128_i32_12 : i32
    %29 = vector.broadcast %28 : i32 to vector<128x128xi32>
    %30 = arith.addi %7, %29 : vector<128x128xi32>
    %c16_i32 = arith.constant 16 : i32
    %31 = vector.broadcast %c16_i32 : i32 to vector<128x128xi32>
    %32 = arith.cmpi sge, %30, %31 : vector<128x128xi32>
    %33 = arith.ori %27, %32 : vector<128x128xi1>
    %cst_13 = arith.constant 0xFF800000 : f32
    %34 = vector.broadcast %cst_13 : f32 to vector<128x128xf32>
    %35 = arith.select %33, %34, %5 : vector<128x128xi1>, vector<128x128xf32>
    %cst_14 = arith.constant dense<0xFF800000> : vector<128xf32>
    %36 = vector.multi_reduction <maximumf>, %35, %cst_14 [1] : vector<128x128xf32> to vector<128xf32>
    %37 = vector.shape_cast %36 : vector<128xf32> to vector<128x1xf32>
    %c0_15 = arith.constant 0 : index
    %c0_16 = arith.constant 0 : index
    %38 = vector.load %arg5[%c0_15, %c0_16] : memref<128x1xf32, #tpu.memory_space<vmem>>, vector<128x1xf32>
    %39 = arith.maximumf %38, %37 : vector<128x1xf32>
    %c0_17 = arith.constant 0 : index
    %c0_18 = arith.constant 0 : index
    %40 = vector.load %arg5[%c0_17, %c0_18] : memref<128x1xf32, #tpu.memory_space<vmem>>, vector<128x1xf32>
    %41 = arith.subf %40, %39 : vector<128x1xf32>
    %42 = math.exp %41 : vector<128x1xf32>
    %c0_19 = arith.constant 0 : index
    %c0_20 = arith.constant 0 : index
    %43 = vector.load %arg6[%c0_19, %c0_20] : memref<128x1xf32, #tpu.memory_space<vmem>>, vector<128x1xf32>
    %44 = arith.mulf %42, %43 : vector<128x1xf32>
    %45 = vector.broadcast %39 : vector<128x1xf32> to vector<128x128xf32>
    %46 = arith.subf %35, %45 : vector<128x128xf32>
    %47 = math.exp %46 : vector<128x128xf32>
    %cst_21 = arith.constant dense<0.000000e+00> : vector<128xf32>
    %48 = vector.multi_reduction <add>, %47, %cst_21 [1] : vector<128x128xf32> to vector<128xf32>
    %49 = vector.shape_cast %48 : vector<128xf32> to vector<128x1xf32>
    %50 = arith.addf %44, %49 : vector<128x1xf32>
    %c0_22 = arith.constant 0 : index
    %c0_23 = arith.constant 0 : index
    %51 = vector.load %arg6[%c0_22, %c0_23] : memref<128x1xf32, #tpu.memory_space<vmem>>, vector<128x1xf32>
    tpu.vector_store %arg6[%c0_22, %c0_23], %50 {strides = array<i32>} : memref<128x1xf32, #tpu.memory_space<vmem>>, vector<128x1xf32>,
    %c0_24 = arith.constant 0 : index
    %c0_25 = arith.constant 0 : index
    %52 = vector.load %arg5[%c0_24, %c0_25] : memref<128x1xf32, #tpu.memory_space<vmem>>, vector<128x1xf32>
    tpu.vector_store %arg5[%c0_24, %c0_25], %39 {strides = array<i32>} : memref<128x1xf32, #tpu.memory_space<vmem>>, vector<128x1xf32>,
    %c0_i32_26 = arith.constant 0 : i32
    %53 = arith.cmpi eq, %arg1, %c0_i32_26 : i32
    %54 = arith.extui %53 : i1 to i32
    %c0_i32_27 = arith.constant 0 : i32
    %55 = arith.cmpi ne, %54, %c0_i32_27 : i32
    scf.if %55 {
      %c0_28 = arith.constant 0 : index
      %c0_29 = arith.constant 0 : index
      %56 = vector.load %arg5[%c0_28, %c0_29] : memref<128x1xf32, #tpu.memory_space<vmem>>, vector<128x1xf32>
      %c0_30 = arith.constant 0 : index
      %c0_31 = arith.constant 0 : index
      %57 = vector.load %arg6[%c0_30, %c0_31] : memref<128x1xf32, #tpu.memory_space<vmem>>, vector<128x1xf32>
      %58 = math.log %57 : vector<128x1xf32>
      %59 = arith.addf %56, %58 : vector<128x1xf32>
      %c0_32 = arith.constant 0 : index
      %c0_33 = arith.constant 0 : index
      %60 = vector.load %arg7[%c0_32, %c0_33] : memref<128x1xf32, #tpu.memory_space<vmem>>, vector<128x1xf32>
      %cst_34 = arith.constant 1.000000e+00 : f32
      %61 = vector.broadcast %cst_34 : f32 to vector<128x1xf32>
      %62 = arith.mulf %61, %59 : vector<128x1xf32>
      %63 = arith.subf %60, %62 : vector<128x1xf32>
      %c128_i32_35 = arith.constant 128 : i32
      %64 = arith.muli %arg0, %c128_i32_35 : i32
      %65 = tpu.iota {dimensions = array<i32: 0>} : vector<128x1xi32>
      %66 = vector.broadcast %64 : i32 to vector<128x1xi32>
      %67 = arith.addi %66, %65 : vector<128x1xi32>
      %c16_i32_36 = arith.constant 16 : i32
      %68 = vector.broadcast %c16_i32_36 : i32 to vector<128x1xi32>
      %69 = arith.cmpi slt, %67, %68 : vector<128x1xi32>
      %cst_37 = arith.constant 0.000000e+00 : f32
      %70 = vector.broadcast %cst_37 : f32 to vector<128x1xf32>
      %71 = arith.select %69, %63, %70 : vector<128x1xi1>, vector<128x1xf32>
      %c0_38 = arith.constant 0 : index
      %c0_39 = arith.constant 0 : index
      %72 = vector.load %arg4[%c0_38, %c0_39] : memref<128x1xf32, #tpu.memory_space<vmem>>, vector<128x1xf32>
      tpu.vector_store %arg4[%c0_38, %c0_39], %71 {strides = array<i32>} : memref<128x1xf32, #tpu.memory_space<vmem>>, vector<128x1xf32>,
    } else {
    }
    return
  }
  func.func @transform_0(%arg0: i32, %arg1: i32) -> (i32, i32) {
    %c0_i32 = arith.constant 0 : i32
    %c0_i32_0 = arith.constant 0 : i32
    return %arg0, %c0_i32 : i32, i32
  }
  func.func @transform_1(%arg0: i32, %arg1: i32) -> (i32, i32) {
    %c0_i32 = arith.constant 0 : i32
    %c0_i32_0 = arith.constant 0 : i32
    return %arg1, %c0_i32 : i32, i32
  }
  func.func @transform_2(%arg0: i32, %arg1: i32) -> (i32, i32) {
    %c0_i32 = arith.constant 0 : i32
    %c0_i32_0 = arith.constant 0 : i32
    return %arg0, %c0_i32 : i32, i32
  }
}

</mosaic_0001>

<bundles_post_ra>
// kernel: tpu_custom_call.1
= control target key start
LH: loop header
LB: loop body
LE: loop exit
PB: predicated region body
PF: predicated region fallthrough
CT: control target
= control target key end

     0   :  { %7 = vsyncpa [#allocation6], 0  ;;  %s2199_s0 = inlined_call_operand.hbm [shape: bf16[128,128], index: 0, kind: input, shape index: {}]   ;;  %s2200_s1 = inlined_call_operand.hbm [shape: bf16[128,128], index: 1, kind: input, shape index: {}]   ;;  %s2201_s2 = inlined_call_operand.vmem [shape: f32[128,1], index: 2, kind: output, shape index: {}]  }
   0x1   :  { %8 = vsyncpa [#allocation8], 0  ;;  %s1324_s9 = smov [#allocation5]  }
   0x2   :  { %s14_s10 = sshll.u32 %s1324_s9, 4  ;;  %s15_s10 = int_to_ptr.vmem [resolvable:$true] %s14_s10 }
   0x3   :  { %s1288_s11 = scalar_lea.vmem %s15_s10, 1024  ;;  %p1293_p1 = scmp.lt.s32.totalorder %s15_s10, %s15_s10 }
   0x4   :  { %p1289_p0 = scmp.ne.s32.totalorder %s15_s10, %s1288_s11  ;;  %p1294_p2 = scmp.lt.s32.totalorder %s1288_s11, %s1288_s11 }
   0x6   :  { %p1295_p3 = por %p1294_p2, %p1293_p1 }
   0x8   :  { %p1296_p4 = pnand %p1295_p3, %p1289_p0 }
   0xa   :  { %1299 = shalt.err (!%p1296_p4)
}
   0xb   :  { %s1325_s12 = smov 64   ;;  %s1326_s13 = smov 4  }
   0xc   :  { %20 = dma.hbm_to_vmem [thread:$0]  %s2199_s0, 1024, %s15_s10, [#allocation6], %s1325_s12, %s1325_s12, %s1326_s13  }
   0xd   :  { %s1327_s16 = smov [#allocation7]  }
   0xe   :  { %s26_s17 = sshll.u32 %s1327_s16, 4  ;;  %s27_s17 = int_to_ptr.vmem [resolvable:$true] %s26_s17 }
   0xf   :  { %s1308_s18 = scalar_lea.vmem %s27_s17, 1024  ;;  %p1313_p6 = scmp.lt.s32.totalorder %s27_s17, %s27_s17 }
  0x10   :  { %p1309_p5 = scmp.ne.s32.totalorder %s27_s17, %s1308_s18  ;;  %p1314_p7 = scmp.lt.s32.totalorder %s1308_s18, %s1308_s18 }
  0x12   :  { %p1315_p8 = por %p1314_p7, %p1313_p6 }
  0x14   :  { %p1316_p9 = pnand %p1315_p8, %p1309_p5 }
  0x16   :  { %1319 = shalt.err (!%p1316_p9)
}
  0x17   :  { %32 = dma.hbm_to_vmem [thread:$0]  %s2200_s1, 1024, %s27_s17, [#allocation8], %s1325_s12, %s1325_s12, %s1326_s13  }
  0x18   :  { %1320 = dma.done.wait [#allocation6], 1024  }
  0x19   :  { %1321 = vsyncadd [#allocation6], 4294966272 }
  0x1a   :  { %1322 = dma.done.wait [#allocation8], 1024  }
  0x1b   :  { %1323 = vsyncadd [#allocation8], 4294966272  ;;  %vm2202_vm0 = vcmask 7168   ;;  %v1328_v0 = vmov 0.0   ;;  %v1196_v1 = vld [vmem:[#allocation7 + $0x38] sm:$0xff]   ;;  %v1197_v2 = vld [vmem:[#allocation7 + $0x30] sm:$0xff]   ;;  %v318_v18 = vlaneseq }
  0x1c   :  { %1087 = vst.msk [vmem:[%s2201_s2 + $0x10] sm:$0xff] %vm2202_vm0, %v1328_v0  ;;  %1088 = vst.msk [vmem:[%s2201_s2 + $0x18] sm:$0xff] %vm2202_vm0, %v1328_v0  ;;  %1139 = vmatprep.subr.bf16.mxu0 %v1196_v1  ;;  %1171 = vmatprep.subr.bf16.mxu1 %v1196_v1  ;;  %v1198_v3 = vld [vmem:[#allocation7 + $0x28] sm:$0xff]   ;;  %v1204_v4 = vld [vmem:[#allocation5] sm:$0xff]   ;;  %v1329_v17 = vmov -inf   ;;  %v2237_v45 = vmov 0 }
  0x1d   :  { %1089 = vst.msk [vmem:[%s2201_s2 + $0x20] sm:$0xff] %vm2202_vm0, %v1328_v0  ;;  %1090 = vst.msk [vmem:[%s2201_s2 + $0x28] sm:$0xff] %vm2202_vm0, %v1328_v0  ;;  %1140 = vmatpush3.bf16.xpose.msra.mxu0 %v1196_v1  ;;  %1179 = vmatpush3.bf16.xpose.msra.mxu1 %v1196_v1  ;;  %v1205_v5 = vld [vmem:[#allocation5 + $0x20] sm:$0xff]   ;;  %v1200_v7 = vld [vmem:[#allocation7 + $0x18] sm:$0xff]   ;;  %v1456_v19 = vshrl.u32 %v318_v18, 7  ;;  %v1459_v21 = vand.u32 127, %v318_v18 }
  0x1e   :  { %1091 = vst.msk [vmem:[%s2201_s2 + $0x30] sm:$0xff] %vm2202_vm0, %v1328_v0  ;;  %1092 = vst.msk [vmem:[%s2201_s2 + $0x38] sm:$0xff] %vm2202_vm0, %v1328_v0  ;;  %1141 = vmatprep.subr.bf16.mxu0 %v1197_v2  ;;  %1172 = vmatprep.subr.bf16.mxu1 %v1197_v2  ;;  %v1199_v6 = vld [vmem:[#allocation7 + $0x20] sm:$0xff]   ;;  %v1201_v8 = vld [vmem:[#allocation7 + $0x10] sm:$0xff]   ;;  %v2243_v48 = vmov 0  ;;  %v2247_v50 = vmov 0 }
  0x1f   :  { %1093 = vst.msk [vmem:[%s2201_s2 + $0x40] sm:$0xff] %vm2202_vm0, %v1328_v0  ;;  %1094 = vst.msk [vmem:[%s2201_s2 + $0x48] sm:$0xff] %vm2202_vm0, %v1328_v0  ;;  %1155 = vmatprep.mubr.bf16.mxu0 %v1204_v4  ;;  %1163 = vmatprep.mubr.bf16.mxu1 %v1205_v5  ;;  %v1202_v9 = vld [vmem:[#allocation7 + $0x8] sm:$0xff]   ;;  %v1203_v10 = vld [vmem:[#allocation7] sm:$0xff]   ;;  %v329_v20 = vadd.s32 80, %v1456_v19  ;;  %v321_v22 = vadd.s32 16, %v1456_v19  ;;  %v1469_v28 = vsub.s32 %v1459_v21, %v1456_v19 }
  0x20   :  { %1095 = vst.msk [vmem:[%s2201_s2 + $0x50] sm:$0xff] %vm2202_vm0, %v1328_v0  ;;  %1096 = vst.msk [vmem:[%s2201_s2 + $0x58] sm:$0xff] %vm2202_vm0, %v1328_v0  ;;  %v1206_v11 = vld [vmem:[#allocation5 + $0x8] sm:$0xff]   ;;  %v1208_v13 = vld [vmem:[#allocation5 + $0x10] sm:$0xff]   ;;  %v322_v24 = vadd.s32 24, %v1456_v19  ;;  %v327_v25 = vadd.s32 64, %v1456_v19 }
  0x21   :  { %1097 = vst.msk [vmem:[%s2201_s2 + $0x60] sm:$0xff] %vm2202_vm0, %v1328_v0  ;;  %1098 = vst.msk [vmem:[%s2201_s2 + $0x68] sm:$0xff] %vm2202_vm0, %v1328_v0  ;;  %v1207_v12 = vld [vmem:[#allocation5 + $0x28] sm:$0xff]   ;;  %v1210_v14 = vld [vmem:[#allocation5 + $0x30] sm:$0xff]   ;;  %v347_v23 = vsub.s32 %v1459_v21, %v329_v20  ;;  %v330_v26 = vadd.s32 88, %v1456_v19  ;;  %v339_v27 = vsub.s32 %v1459_v21, %v321_v22  ;;  %v328_v29 = vadd.s32 72, %v1456_v19 }
  0x22   :  { %1099 = vst.msk [vmem:[%s2201_s2 + $0x70] sm:$0xff] %vm2202_vm0, %v1328_v0  ;;  %1100 = vst.msk [vmem:[%s2201_s2 + $0x78] sm:$0xff] %vm2202_vm0, %v1328_v0  ;;  %v1209_v15 = vld [vmem:[#allocation5 + $0x18] sm:$0xff]   ;;  %v320_v30 = vadd.s32 8, %v1456_v19  ;;  %vm2203_vm2 = vcmp.ge.s32.totalorder %v1459_v21, 16  ;;  %v340_v31 = vsub.s32 %v1459_v21, %v322_v24  ;;  %v345_v32 = vsub.s32 %v1459_v21, %v327_v25 }
  0x23   :  { %61 = vst.msk [vmem:[#allocation3] sm:$0xff] %vm2202_vm0, %v1328_v0  ;;  %62 = vst.msk [vmem:[#allocation3 + $0x8] sm:$0xff] %vm2202_vm0, %v1328_v0  ;;  %v1211_v16 = vld [vmem:[#allocation5 + $0x38] sm:$0xff]   ;;  %vm528_vm1 = vcmp.eq.s32.totalorder %v347_v23, 0  ;;  %v1477_v33 = vsub.s32 %v1459_v21, %v330_v26  ;;  %vm520_vm3 = vcmp.eq.s32.totalorder %v339_v27, 0  ;;  %v325_v34 = vadd.s32 48, %v1456_v19 }
  0x24   :  { %63 = vst.msk [vmem:[#allocation3 + $0x10] sm:$0xff] %vm2202_vm0, %v1328_v0  ;;  %64 = vst.msk [vmem:[#allocation3 + $0x18] sm:$0xff] %vm2202_vm0, %v1328_v0  ;;  %vm518_vm4 = vcmp.eq.s32.totalorder %v1469_v28, 0  ;;  %v1482_v35 = vsub.s32 %v1459_v21, %v328_v29  ;;  %v338_v37 = vsub.s32 %v1459_v21, %v320_v30  ;;  %vm375_vm7 = vcmp.eq.s32.totalorder %v339_v27, 8 }
  0x25   :  { %65 = vst.msk [vmem:[#allocation3 + $0x20] sm:$0xff] %vm2202_vm0, %v1328_v0  ;;  %66 = vst.msk [vmem:[#allocation3 + $0x28] sm:$0xff] %vm2202_vm0, %v1328_v0  ;;  %1142 = vmatpush3.bf16.xpose.msra.mxu0 %v1197_v2  ;;  %1180 = vmatpush3.bf16.xpose.msra.mxu1 %v1197_v2  ;;  %vm391_vm8 = vcmp.eq.s32.totalorder %v339_v27, 4294967288  ;;  %vm521_vm11 = vcmp.eq.s32.totalorder %v340_v31, 0  ;;  %vm526_vm12 = vcmp.eq.s32.totalorder %v345_v32, 0  ;;  %vm529_vm13 = vcmp.eq.s32.totalorder %v1477_v33, 0 }
  0x26   :  { %67 = vst.msk [vmem:[#allocation3 + $0x30] sm:$0xff] %vm2202_vm0, %v1328_v0  ;;  %68 = vst.msk [vmem:[#allocation3 + $0x38] sm:$0xff] %vm2202_vm0, %v1328_v0  ;;  %1143 = vmatprep.subr.bf16.mxu0 %v1198_v3  ;;  %1173 = vmatprep.subr.bf16.mxu1 %v1198_v3  ;;  %v1506_v40 = vsub.s32 %v1459_v21, %v325_v34  ;;  %v333_v41 = vadd.s32 112, %v1456_v19  ;;  %v323_v42 = vadd.s32 32, %v1456_v19  ;;  %v331_v43 = vadd.s32 96, %v1456_v19 }
  0x27   :  { %69 = vst.msk [vmem:[#allocation3 + $0x40] sm:$0xff] %vm2202_vm0, %v1328_v0  ;;  %70 = vst.msk [vmem:[#allocation3 + $0x48] sm:$0xff] %vm2202_vm0, %v1328_v0  ;;  %v326_v44 = vadd.s32 56, %v1456_v19  ;;  %v332_v49 = vadd.s32 104, %v1456_v19  ;;  %vm2245_vm5 = vcmp.eq.s32.totalorder %v347_v23, 4294967288  ;;  %v2251_v52 = vmov 0 }
  0x28   :  { %71 = vst.msk [vmem:[#allocation3 + $0x50] sm:$0xff] %vm2202_vm0, %v1328_v0  ;;  %72 = vst.msk [vmem:[#allocation3 + $0x58] sm:$0xff] %vm2202_vm0, %v1328_v0  ;;  %v1551_v51 = vsub.s32 %v1459_v21, %v333_v41  ;;  %v1566_v55 = vsub.s32 %v1459_v21, %v323_v42  ;;  %v1569_v56 = vsub.s32 %v1459_v21, %v331_v43  ;;  %v334_v58 = vadd.s32 120, %v1456_v19 }
  0x29   :  { %73 = vst.msk [vmem:[#allocation3 + $0x60] sm:$0xff] %vm2202_vm0, %v1328_v0  ;;  %74 = vst.msk [vmem:[#allocation3 + $0x68] sm:$0xff] %vm2202_vm0, %v1328_v0  ;;  %v1572_v57 = vsub.s32 %v1459_v21, %v326_v44  ;;  %v2255_v59 = vmov 0  ;;  %v2258_v63 = vmov 0  ;;  %v324_v5 = vadd.s32 40, %v1456_v19 }
  0x2a   :  { %75 = vst.msk [vmem:[#allocation3 + $0x70] sm:$0xff] %vm2202_vm0, %v1328_v0  ;;  %76 = vst.msk [vmem:[#allocation3 + $0x78] sm:$0xff] %vm2202_vm0, %v1328_v0  ;;  %v352_v22 = vsub.s32 %v1459_v21, %v334_v58  ;;  %v2287_v24 = vmov 0 }
  0x2b   :  { %77 = vst.msk [vmem:[#allocation4] sm:$0xff] %vm2202_vm0, %v1328_v0  ;;  %78 = vst.msk [vmem:[#allocation4 + $0x8] sm:$0xff] %vm2202_vm0, %v1328_v0 }
  0x2c   :  { %79 = vst.msk [vmem:[#allocation4 + $0x10] sm:$0xff] %vm2202_vm0, %v1328_v0  ;;  %80 = vst.msk [vmem:[#allocation4 + $0x18] sm:$0xff] %vm2202_vm0, %v1328_v0 }
  0x2d   :  { %81 = vst.msk [vmem:[#allocation4 + $0x20] sm:$0xff] %vm2202_vm0, %v1328_v0  ;;  %82 = vst.msk [vmem:[#allocation4 + $0x28] sm:$0xff] %vm2202_vm0, %v1328_v0  ;;  %1144 = vmatpush3.bf16.xpose.msra.mxu0 %v1198_v3  ;;  %1181 = vmatpush3.bf16.xpose.msra.mxu1 %v1198_v3 }
  0x2e   :  { %83 = vst.msk [vmem:[#allocation4 + $0x30] sm:$0xff] %vm2202_vm0, %v1328_v0  ;;  %84 = vst.msk [vmem:[#allocation4 + $0x38] sm:$0xff] %vm2202_vm0, %v1328_v0  ;;  %1145 = vmatprep.subr.bf16.mxu0 %v1199_v6  ;;  %1174 = vmatprep.subr.bf16.mxu1 %v1199_v6 }
  0x2f   :  { %85 = vst.msk [vmem:[#allocation4 + $0x40] sm:$0xff] %vm2202_vm0, %v1328_v0  ;;  %86 = vst.msk [vmem:[#allocation4 + $0x48] sm:$0xff] %vm2202_vm0, %v1328_v0 }
  0x30   :  { %87 = vst.msk [vmem:[#allocation4 + $0x50] sm:$0xff] %vm2202_vm0, %v1328_v0  ;;  %88 = vst.msk [vmem:[#allocation4 + $0x58] sm:$0xff] %vm2202_vm0, %v1328_v0 }
  0x31   :  { %89 = vst.msk [vmem:[#allocation4 + $0x60] sm:$0xff] %vm2202_vm0, %v1328_v0  ;;  %90 = vst.msk [vmem:[#allocation4 + $0x68] sm:$0xff] %vm2202_vm0, %v1328_v0 }
  0x32   :  { %91 = vst.msk [vmem:[#allocation4 + $0x70] sm:$0xff] %vm2202_vm0, %v1328_v0  ;;  %92 = vst.msk [vmem:[#allocation4 + $0x78] sm:$0xff] %vm2202_vm0, %v1328_v0 }
  0x33   :  { %55 = vst.msk [vmem:[#allocation2 + $0x50] sm:$0xff] %vm2202_vm0, %v1329_v17  ;;  %45 = vst.msk [vmem:[#allocation2] sm:$0xff] %vm2202_vm0, %v1329_v17 }
  0x34   :  { %46 = vst.msk [vmem:[#allocation2 + $0x8] sm:$0xff] %vm2202_vm0, %v1329_v17  ;;  %47 = vst.msk [vmem:[#allocation2 + $0x10] sm:$0xff] %vm2202_vm0, %v1329_v17 }
  0x35   :  { %1146 = vmatpush3.bf16.xpose.msra.mxu0 %v1199_v6  ;;  %1182 = vmatpush3.bf16.xpose.msra.mxu1 %v1199_v6  ;;  %48 = vst.msk [vmem:[#allocation2 + $0x18] sm:$0xff] %vm2202_vm0, %v1329_v17  ;;  %49 = vst.msk [vmem:[#allocation2 + $0x20] sm:$0xff] %vm2202_vm0, %v1329_v17  ;;  %v1624_v6 = vsub.s32 %v1459_v21, %v332_v49 }
  0x36   :  { %1147 = vmatprep.subr.bf16.mxu0 %v1200_v7  ;;  %1175 = vmatprep.subr.bf16.mxu1 %v1200_v7  ;;  %50 = vst.msk [vmem:[#allocation2 + $0x28] sm:$0xff] %vm2202_vm0, %v1329_v17  ;;  %51 = vst.msk [vmem:[#allocation2 + $0x30] sm:$0xff] %vm2202_vm0, %v1329_v17 }
  0x37   :  { %52 = vst.msk [vmem:[#allocation2 + $0x38] sm:$0xff] %vm2202_vm0, %v1329_v17  ;;  %53 = vst.msk [vmem:[#allocation2 + $0x40] sm:$0xff] %vm2202_vm0, %v1329_v17 }
  0x38   :  { %54 = vst.msk [vmem:[#allocation2 + $0x48] sm:$0xff] %vm2202_vm0, %v1329_v17  ;;  %56 = vst.msk [vmem:[#allocation2 + $0x58] sm:$0xff] %vm2202_vm0, %v1329_v17 }
  0x39   :  { %57 = vst.msk [vmem:[#allocation2 + $0x60] sm:$0xff] %vm2202_vm0, %v1329_v17  ;;  %58 = vst.msk [vmem:[#allocation2 + $0x68] sm:$0xff] %vm2202_vm0, %v1329_v17 }
  0x3a   :  { %59 = vst.msk [vmem:[#allocation2 + $0x70] sm:$0xff] %vm2202_vm0, %v1329_v17  ;;  %60 = vst.msk [vmem:[#allocation2 + $0x78] sm:$0xff] %vm2202_vm0, %v1329_v17  ;;  %v1890_v0 = vld [vmem:[#allocation2] sm:$0xff] }
  0x3b   :  { %vm1486_vm6 = vmor %vm528_vm1, %vm2203_vm2  ;;  %2322 = vst [vmem:[#allocation15_spill] sm:$0xff] %v1890_v0  ;;  %v1930_v39 = vld [vmem:[#allocation2 + $0x8] sm:$0xff] }
  0x3c   :  { %vm1493_vm10 = vmor %vm520_vm3, %vm2203_vm2  ;;  %2334 = vst [vmem:[#allocation23_spill] sm:$0xff] %v1930_v39 }
  0x3d   :  { %1148 = vmatpush3.bf16.xpose.msra.mxu0 %v1200_v7  ;;  %1183 = vmatpush3.bf16.xpose.msra.mxu1 %v1200_v7  ;;  %vm1501_vm15 = vmor %vm518_vm4, %vm2203_vm2  ;;  %v2270_v7 = vmov 0 }
  0x3e   :  { %1149 = vmatprep.subr.bf16.mxu0 %v1201_v8  ;;  %1176 = vmatprep.subr.bf16.mxu1 %v1201_v8  ;;  %vm1515_vm4 = vmor %vm375_vm7, %vm391_vm8  ;;  %vm392_vm8 = vcmp.eq.s32.totalorder %v340_v31, 4294967288  ;;  %v1909_v18 = vld [vmem:[#allocation2 + $0x40] sm:$0xff] }
  0x3f   :  { %v2238_v45 = vsel %vm1515_vm4, 4294967295, %v2237_v45  ;;  %vm1521_vm14 = vmor %vm521_vm11, %vm2203_vm2  ;;  %vm2274_vm11 = vcmp.eq.s32.totalorder %v1482_v35, 8  ;;  %2328 = vst [vmem:[#allocation19_spill] sm:$0xff] %v1909_v18  ;;  %v1911_v17 = vld [vmem:[#allocation2 + $0x58] sm:$0xff]  ;;  %v1928_v27 = vld [vmem:[#allocation2 + $0x48] sm:$0xff] }
  0x40   :  { %vm1528_vm9 = vmor %vm526_vm12, %vm2203_vm2  ;;  %vm2246_vm12 = vcmp.eq.s32.totalorder %v347_v23, 8  ;;  %v342_v23 = vsub.s32 %v1459_v21, %v324_v5  ;;  %2329 = vst [vmem:[#allocation20_spill] sm:$0xff] %v1911_v17 }
  0x41   :  { %vm1536_vm7 = vmor %vm529_vm13, %vm2203_vm2  ;;  %vm2249_vm13 = vcmp.eq.s32.totalorder %v345_v32, 4294967288  ;;  %vm2250_vm2 = vcmp.eq.s32.totalorder %v345_v32, 8  ;;  %2333 = vst [vmem:[#allocation22_spill] sm:$0xff] %v1928_v27  ;;  %v1964_v26 = vld [vmem:[#allocation2 + $0x70] sm:$0xff] }
  0x42   :  { %v2244_v48 = vsel %vm1536_vm7, 4294967295, %v2243_v48  ;;  %vm1545_vm0 = vmor %vm2246_vm12, %vm2245_vm5  ;;  %vm2254_vm5 = vcmp.eq.s32.totalorder %v338_v37, 8  ;;  %2342 = vst [vmem:[#allocation27_spill] sm:$0xff] %v1964_v26 }
  0x43   :  { %v2248_v50 = vsel %vm1545_vm0, 4294967295, %v2247_v50  ;;  %vm1555_vm7 = vmor %vm2250_vm2, %vm2249_vm13  ;;  %vm2253_vm2 = vcmp.eq.s32.totalorder %v338_v37, 4294967288  ;;  %vm2257_vm13 = vcmp.eq.s32.totalorder %v340_v31, 8 }
  0x44   :  { %v2252_v52 = vsel %vm1555_vm7, 4294967295, %v2251_v52  ;;  %vm1577_vm12 = vmor %vm2254_vm5, %vm2253_vm2  ;;  %vm2278_vm7 = vcmp.eq.s32.totalorder %v1506_v40, 0 }
  0x45   :  { %1150 = vmatpush3.bf16.xpose.msra.mxu0 %v1201_v8  ;;  %1184 = vmatpush3.bf16.xpose.msra.mxu1 %v1201_v8  ;;  %v2256_v59 = vsel %vm1577_vm12, 4294967295, %v2255_v59  ;;  %vm1596_vm2 = vmor %vm2257_vm13, %vm392_vm8  ;;  %vm2265_vm13 = vcmp.eq.s32.totalorder %v338_v37, 0 }
  0x46   :  { %1151 = vmatprep.subr.bf16.mxu0 %v1202_v9  ;;  %1177 = vmatprep.subr.bf16.mxu1 %v1202_v9  ;;  %v2259_v63 = vsel %vm1596_vm2, 4294967295, %v2258_v63  ;;  %vm2292_vm2 = vcmp.eq.s32.totalorder %v1569_v56, 4294967288 }
  0x4d   :  { %1152 = vmatpush3.bf16.xpose.msra.mxu0 %v1202_v9  ;;  %1185 = vmatpush3.bf16.xpose.msra.mxu1 %v1202_v9 }
  0x4e   :  { %1153 = vmatprep.subr.bf16.mxu0 %v1203_v10  ;;  %1178 = vmatprep.subr.bf16.mxu1 %v1203_v10 }
  0x55   :  { %1154 = vmatpush3.bf16.xpose.msra.mxu0 %v1203_v10  ;;  %1186 = vmatpush3.bf16.xpose.msra.mxu1 %v1203_v10  ;;  %v2275_v10 = vmov 0 }
  0x5c   :  { %1156 = vmatmul.mubr.bf16.vlgmr.msra.gmra.mxu0 %v1206_v11  ;;  %1164 = vmatmul.mubr.bf16.vlgmr.msra.gmra.mxu1 %v1207_v12 }
  0x5d   :  { %1159 = vmatprep.mubr.bf16.mxu0 %v1208_v13  ;;  %1167 = vmatprep.mubr.bf16.mxu1 %v1210_v14  ;;  %v1892_v13 = vld [vmem:[#allocation2 + $0x18] sm:$0xff] }
  0x5e   :  { %2323 = vst [vmem:[#allocation16_spill] sm:$0xff] %v1892_v13 }
  0x64   :  { %1160 = vmatmul.mubr.bf16.gmra.mxu0 %v1209_v15  ;;  %1168 = vmatmul.mubr.bf16.gmra.mxu1 %v1211_v16  ;;  %v2283_v16 = vmov 0 }
 0x11c   :  { %v1561_v53 = vpop.f32.mrf.mxu0  ;;  %v1563_v54 = vpop.f32.mrf.mxu1 }
 0x11d   :  { %v1584_v60 = vsel %vm1486_vm6, -inf, %v1563_v54  ;;  %v1589_v61 = vsel %vm1493_vm10, -inf, %v1561_v53  ;;  %vm2260_vm6 = vcmp.ge.s32.totalorder %v1459_v21, 16  ;;  %vm2261_vm10 = vcmp.eq.s32.totalorder %v1482_v35, 0 }
 0x11e   :  { %589 = vmax.xlane.f32.xlu0 %v1584_v60  ;;  %v1604_v1 = vpop.f32.mrf.mxu1  ;;  %573 = vmax.xlane.f32.xlu1 %v1589_v61  ;;  %v255_v2 = vpop.f32.mrf.mxu0  ;;  %vm1611_vm5 = vmor %vm2261_vm10, %vm2260_vm6  ;;  %vm2269_vm10 = vcmp.eq.s32.totalorder %v1477_v33, 8 }
 0x11f   :  { %vm2264_vm8 = vmmov %vm2260_vm6  ;;  %vm2268_vm6 = vcmp.eq.s32.totalorder %v1477_v33, 4294967288  ;;  %v1671_v14 = vsel %vm1501_vm15, -inf, %v255_v2  ;;  %vm2285_vm15 = vcmp.eq.s32.totalorder %v1551_v51, 4294967288  ;;  %v1742_v31 = vsel %vm1528_vm9, -inf, %v1604_v1 }
 0x120   :  { %vm1618_vm3 = vmor %vm2265_vm13, %vm2264_vm8  ;;  %vm2272_vm8 = vcmp.eq.s32.totalorder %v1469_v28, 8  ;;  %vm2273_vm13 = vcmp.eq.s32.totalorder %v1482_v35, 4294967288  ;;  %v1653_v11 = vpop.f32.mrf.mxu0  ;;  %v1655_v12 = vpop.f32.mrf.mxu1  ;;  %vm2301_vm9 = vcmp.eq.s32.totalorder %v1572_v57, 8 }
 0x121   :  { %vm1632_vm0 = vmor %vm2269_vm10, %vm2268_vm6  ;;  %v1638_v8 = vsel %vm2272_vm8, %v255_v2, 0.0  ;;  %vm2277_vm8 = vcmp.ge.s32.totalorder %v1459_v21, 16  ;;  %v1676_v15 = vsel %vm1521_vm14, -inf, %v1653_v11  ;;  %vm2289_vm6 = vcmp.eq.s32.totalorder %v1566_v55, 8 }
 0x122   :  { %v2271_v7 = vsel %vm1632_vm0, 4294967295, %v2270_v7  ;;  %vm1647_vm1 = vmor %vm2274_vm11, %vm2273_vm13  ;;  %vm393_vm13 = vcmp.eq.s32.totalorder %v1566_v55, 4294967288  ;;  %v1692_v19 = vpop.f32.mrf.mxu1  ;;  %569 = vmax.xlane.f32.xlu0 %v1671_v14  ;;  %575 = vmax.xlane.f32.xlu1 %v1676_v15  ;;  %v1696_v20 = vpop.f32.mrf.mxu0  ;;  %vm396_vm0 = vcmp.eq.s32.totalorder %v1572_v57, 4294967288  ;;  %vm2293_vm14 = vcmp.eq.s32.totalorder %v1569_v56, 8 }
 0x123   :  { %v2276_v10 = vsel %vm1647_vm1, 4294967295, %v2275_v10  ;;  %vm1661_vm4 = vmor %vm2278_vm7, %vm2277_vm8  ;;  %vm2281_vm7 = vcmp.eq.s32.totalorder %v1506_v40, 4294967288  ;;  %vm2282_vm8 = vcmp.eq.s32.totalorder %v1506_v40, 8  ;;  %vm2309_vm1 = vcmp.eq.s32.totalorder %v1624_v6, 8 }
 0x124   :  { %vm1682_vm11 = vmor %vm2282_vm8, %vm2281_vm7  ;;  %vm2286_vm7 = vcmp.eq.s32.totalorder %v1551_v51, 8  ;;  %v1725_v28 = vpop.f32.mrf.mxu0  ;;  %v1727_v29 = vpop.f32.mrf.mxu1  ;;  %v1803_v46 = vsel %vm1611_vm5, -inf, %v1692_v19  ;;  %v1808_v47 = vsel %vm1618_vm3, -inf, %v1696_v20 }
 0x125   :  { %v2284_v16 = vsel %vm1682_vm11, 4294967295, %v2283_v16  ;;  %vm1705_vm8 = vmor %vm2286_vm7, %vm2285_vm15  ;;  %vm2297_vm15 = vcmp.ge.s32.totalorder %v1459_v21, 16  ;;  %vm2298_vm7 = vcmp.eq.s32.totalorder %v1572_v57, 0  ;;  %v1824_v3 = vsel %vm1661_vm4, -inf, %v1725_v28 }
 0x126   :  { %v2288_v24 = vsel %vm1705_vm8, 4294967295, %v2287_v24  ;;  %vm1713_vm10 = vmor %vm2289_vm6, %vm393_vm13  ;;  %vm2296_vm6 = vnez %v2244_v48  ;;  %585 = vmax.xlane.f32.xlu0 %v1742_v31  ;;  %v1765_v36 = vpop.f32.mrf.mxu0  ;;  %v1767_v37 = vpop.f32.mrf.mxu1  ;;  %vm2308_vm8 = vcmp.eq.s32.totalorder %v1624_v6, 4294967288  ;;  %v1330_v48 = vmov 0  }
 0x127   :  { %vm1735_vm12 = vmor %vm2293_vm14, %vm2292_vm2  ;;  %v1747_v32 = vsel %vm2296_vm6, -inf, %v1655_v12  ;;  %vm404_vm14 = vcmp.eq.s32.totalorder %v352_v22, 4294967288  ;;  %vm2304_vm6 = vcmp.eq.s32.totalorder %v342_v23, 4294967288  ;;  %1194 = vset.pattern.permute.xlu1 %v1330_v48  ;;  %1195 = vset.pattern.permute.xlu0 %v1330_v48  ;;  %vm522_vm4 = vcmp.eq.s32.totalorder %v1566_v55, 0 }
 0x128   :  { %vm1753_vm13 = vmor %vm2298_vm7, %vm2297_vm15  ;;  %591 = vmax.xlane.f32.xlu1 %v1747_v32  ;;  %vm2305_vm15 = vcmp.eq.s32.totalorder %v342_v23, 8  ;;  %v1790_v42 = vpop.f32.mrf.mxu0  ;;  %v1170_v43 = vpop.f32.mrf.mxu1 }
 0x129   :  { %vm1773_vm2 = vmor %vm2301_vm9, %vm396_vm0  ;;  %vm532_vm0 = vcmp.eq.s32.totalorder %v1551_v51, 0  ;;  %vm533_vm9 = vcmp.eq.s32.totalorder %v352_v22, 0  ;;  %v1813_v57 = vsel %vm404_vm14, %v1170_v43, 0.0  ;;  %v1833_v4 = vsel %vm1753_vm13, -inf, %v1790_v42 }
 0x12a   :  { %vm1782_vm7 = vmor %vm2305_vm15, %vm2304_vm6  ;;  %571 = vmax.xlane.f32.xlu0 %v1808_v47  ;;  %v1817_v58 = vpop.f32.mrf.mxu0  ;;  %v1819_v2 = vpop.f32.mrf.mxu1  ;;  %vm523_vm14 = vcmp.eq.s32.totalorder %v342_v23, 0  ;;  %vm530_vm15 = vcmp.eq.s32.totalorder %v1569_v56, 0  ;;  %v1880_v23 = vld [vmem:[#allocation2 + $0x50] sm:$0xff] }
 0x12b   :  { %vm1796_vm11 = vmor %vm2309_vm1, %vm2308_vm8  ;;  %vm2312_vm1 = vcmp.ge.s32.totalorder %v1459_v21, 16  ;;  %2318 = vst [vmem:[#allocation11_spill] sm:$0xff] %v1880_v23 }
 0x12c   :  { %587 = vmax.xlane.f32.xlu1 %v1803_v46  ;;  %vm551_vm3 = vmor %vm532_vm0, %vm2312_vm1 }
 0x12d   :  { %vm2313_vm5 = vmmov %vm2312_vm1  ;;  %v1848_v51 = vsel %vm551_vm3, -inf, %v1727_v29 }
 0x12e   :  { %vm552_vm8 = vmor %vm533_vm9, %vm2313_vm5  ;;  %581 = vmax.xlane.f32.xlu0 %v1824_v3  ;;  %vm531_vm9 = vcmp.eq.s32.totalorder %v1624_v6, 0 }
 0x12f   :  { %vm2314_vm13 = vmmov %vm2312_vm1  ;;  %v1852_v33 = vsel %vm552_vm8, -inf, %v1170_v43  ;;  %v1882_v43 = vld [vmem:[#allocation2 + $0x10] sm:$0xff] }
 0x130   :  { %583 = vmax.xlane.f32.xlu1 %v1833_v4  ;;  %vm541_vm6 = vmor %vm522_vm4, %vm2314_vm13  ;;  %2319 = vst [vmem:[#allocation12_spill] sm:$0xff] %v1882_v43 }
 0x131   :  { %vm2315_vm0 = vmmov %vm2312_vm1  ;;  %v1861_v55 = vsel %vm541_vm6, -inf, %v1765_v36 }
 0x132   :  { %vm542_vm1 = vmor %vm523_vm14, %vm2315_vm0  ;;  %597 = vmax.xlane.f32.xlu0 %v1848_v51  ;;  %vm2324_vm14 = vcmask 7168  }
 0x133   :  { %vm2316_vm3 = vmmov %vm2315_vm0  ;;  %v1866_v22 = vsel %vm542_vm1, -inf, %v1817_v58 }
 0x134   :  { %599 = vmax.xlane.f32.xlu1 %v1852_v33  ;;  %vm549_vm5 = vmor %vm530_vm15, %vm2316_vm3 }
 0x135   :  { %vm2317_vm4 = vmmov %vm2315_vm0  ;;  %v1873_v56 = vsel %vm549_vm5, -inf, %v1767_v37 }
 0x136   :  { %vm550_vm8 = vmor %vm531_vm9, %vm2317_vm4  ;;  %577 = vmax.xlane.f32.xlu0 %v1861_v55 }
 0x137   :  { %v1876_v6 = vsel %vm550_vm8, -inf, %v1819_v2  ;;  %vm2325_vm13 = vmmov %vm2324_vm14 }
 0x138   :  { %579 = vmax.xlane.f32.xlu1 %v1866_v22  ;;  %vm2330_vm6 = vmmov %vm2325_vm13 }
 0x139   :  { %vm2331_vm15 = vmmov %vm2330_vm6 }
 0x13a   :  { %593 = vmax.xlane.f32.xlu0 %v1873_v56  ;;  %vm2335_vm0 = vmmov %vm2330_vm6 }
 0x13b   :  { %vm2336_vm1 = vmmov %vm2335_vm0 }
 0x13c   :  { %595 = vmax.xlane.f32.xlu1 %v1876_v6  ;;  %vm2340_vm9 = vmmov %vm2335_vm0 }
 0x13d   :  { %vm2341_vm3 = vmmov %vm2335_vm0 }
 0x13e   :  { %vm2344_vm5 = vmmov %vm2335_vm0 }
 0x13f   :  { %vm2345_vm4 = vmmov %vm2335_vm0 }
 0x140   :  { %vm2346_vm8 = vmmov %vm2335_vm0 }
 0x1a7   :  { %v590_v21 = vpop.xlane.xlu0 %589  ;;  %v574_v48 = vpop.xlane.xlu1 %573 }
 0x1a8   :  { %v1885_v35 = vmax.f32 %v1880_v23, %v590_v21  ;;  %v1888_v41 = vmax.f32 %v1882_v43, %v574_v48  ;;  %v1945_v23 = vld [vmem:[#allocation2 + $0x30] sm:$0xff] }
 0x1a9   :  { %2338 = vst [vmem:[#allocation25_spill] sm:$0xff] %v1945_v23 }
 0x1aa   :  { %2320 = vst [vmem:[#allocation13_spill] sm:$0xff] %v1885_v35  ;;  %2321 = vst [vmem:[#allocation14_spill] sm:$0xff] %v1888_v41  ;;  %725 = vperm.xlu1 %1194, %v1888_v41  }
 0x1ab   :  { %915 = vst.msk [vmem:[#allocation2 + $0x50] sm:$0xff] %vm2324_vm14, %v1885_v35  ;;  %v570_v21 = vpop.xlane.xlu0 %569  ;;  %v576_v48 = vpop.xlane.xlu1 %575  ;;  %vm2347_vm14 = vmmov %vm2335_vm0 }
 0x1ac   :  { %907 = vst.msk [vmem:[#allocation2 + $0x10] sm:$0xff] %vm2325_vm13, %v1888_v41  ;;  %v1904_v49 = vmax.f32 %v1890_v0, %v570_v21  ;;  %v1907_v5 = vmax.f32 %v1892_v13, %v576_v48  ;;  %v1947_v41 = vld [vmem:[#allocation2 + $0x38] sm:$0xff]  ;;  %vm2348_vm13 = vmmov %vm2335_vm0 }
 0x1ad   :  { %2339 = vst [vmem:[#allocation26_spill] sm:$0xff] %v1947_v41 }
 0x1ae   :  { %2326 = vst [vmem:[#allocation17_spill] sm:$0xff] %v1904_v49  ;;  %2327 = vst [vmem:[#allocation18_spill] sm:$0xff] %v1907_v5  ;;  %715 = vperm.xlu0 %1195, %v1904_v49  }
 0x1af   :  { %905 = vst.msk [vmem:[#allocation2] sm:$0xff] %vm2330_vm6, %v1904_v49  ;;  %v586_v21 = vpop.xlane.xlu0 %585  ;;  %vm2349_vm6 = vmmov %vm2335_vm0 }
 0x1b0   :  { %908 = vst.msk [vmem:[#allocation2 + $0x18] sm:$0xff] %vm2331_vm15, %v1907_v5  ;;  %v1923_v9 = vmax.f32 %v1909_v18, %v586_v21  ;;  %vm2350_vm15 = vmmov %vm2335_vm0 }
 0x1b1   :  { %v592_v48 = vpop.xlane.xlu1 %591 }
 0x1b2   :  { %2332 = vst [vmem:[#allocation21_spill] sm:$0xff] %v1923_v9  ;;  %v1926_v34 = vmax.f32 %v1911_v17, %v592_v48  ;;  %913 = vst.msk [vmem:[#allocation2 + $0x40] sm:$0xff] %vm2335_vm0, %v1923_v9  ;;  %755 = vperm.xlu1 %1194, %v1923_v9   ;;  %v1985_v9 = vld [vmem:[#allocation2 + $0x28] sm:$0xff] }
 0x1b3   :  { %v572_v62 = vpop.xlane.xlu0 %571 }
 0x1b4   :  { %916 = vst.msk [vmem:[#allocation2 + $0x58] sm:$0xff] %vm2336_vm1, %v1926_v34  ;;  %v1943_v17 = vmax.f32 %v1930_v39, %v572_v62  ;;  %v2004_v39 = vld [vmem:[#allocation2 + $0x68] sm:$0xff]  ;;  %vm2351_vm1 = vnez %v2238_v45 }
 0x1b5   :  { %v588_v21 = vpop.xlane.xlu1 %587 }
 0x1b6   :  { %v1940_v48 = vmax.f32 %v1928_v27, %v588_v21  ;;  %2337 = vst [vmem:[#allocation24_spill] sm:$0xff] %v1943_v17  ;;  %906 = vst.msk [vmem:[#allocation2 + $0x8] sm:$0xff] %vm2341_vm3, %v1943_v17  ;;  %730 = vperm.xlu1 %1194, %v1907_v5   ;;  %v1966_v27 = vld [vmem:[#allocation2 + $0x78] sm:$0xff]  ;;  %vm2356_vm3 = vnez %v2252_v52  ;;  %v2362_v52 = vsel %vm1782_vm7, %v1817_v58, 0.0  ;;  %vm2372_vm7 = vnez %v2288_v24 }
 0x1b7   :  { %v582_v62 = vpop.xlane.xlu0 %581  ;;  %2343 = vst [vmem:[#allocation28_spill] sm:$0xff] %v1966_v27  ;;  %v2357_v45 = vsel %vm2356_vm3, %v1604_v1, 0.0  ;;  %vm2382_vm3 = vmmov %vm2335_vm0 }
 0x1b8   :  { %914 = vst.msk [vmem:[#allocation2 + $0x48] sm:$0xff] %vm2340_vm9, %v1940_v48  ;;  %v1959_v18 = vmax.f32 %v1945_v23, %v582_v62  ;;  %vm2354_vm9 = vnez %v2284_v16 }
 0x1b9   :  { %v584_v21 = vpop.xlane.xlu1 %583 }
 0x1ba   :  { %v1962_v43 = vmax.f32 %v1947_v41, %v584_v21  ;;  %720 = vperm.xlu1 %1194, %v1943_v17   ;;  %911 = vst.msk [vmem:[#allocation2 + $0x30] sm:$0xff] %vm2344_vm5, %v1959_v18  ;;  %v1983_v17 = vld [vmem:[#allocation2 + $0x20] sm:$0xff]  ;;  %vm2358_vm5 = vnez %v2256_v59  ;;  %v2363_v59 = vsel %vm1773_vm2, %v1790_v42, 0.0  ;;  %vm2369_vm2 = vnez %v2248_v50 }
 0x1bb   :  { %v598_v62 = vpop.xlane.xlu0 %597 }
 0x1bc   :  { %912 = vst.msk [vmem:[#allocation2 + $0x38] sm:$0xff] %vm2345_vm4, %v1962_v43  ;;  %v1978_v5 = vmax.f32 %v1964_v26, %v598_v62  ;;  %vm2364_vm4 = vnez %v2276_v10  ;;  %v2371_v10 = vsel %vm1735_vm12, %v1767_v37, 0.0  ;;  %vm2374_vm12 = vmmov %vm2335_vm0 }
 0x1bd   :  { %v600_v21 = vpop.xlane.xlu1 %599  ;;  %v2365_v1 = vsel %vm2364_vm4, %v1692_v19, 0.0  ;;  %vm2385_vm4 = vmmov %vm2335_vm0 }
 0x1be   :  { %v1981_v13 = vmax.f32 %v1966_v27, %v600_v21  ;;  %765 = vperm.xlu1 %1194, %v1885_v35   ;;  %919 = vst.msk [vmem:[#allocation2 + $0x70] sm:$0xff] %vm2346_vm8, %v1978_v5  ;;  %v2002_v35 = vld [vmem:[#allocation2 + $0x60] sm:$0xff]  ;;  %vm2366_vm8 = vnez %v2271_v7  ;;  %v2373_v7 = vsel %vm2372_vm7, %v1727_v29, 0.0  ;;  %vm2391_vm7 = vmmov %vm2335_vm0 }
 0x1bf   :  { %v578_v62 = vpop.xlane.xlu0 %577 }
 0x1c0   :  { %920 = vst.msk [vmem:[#allocation2 + $0x78] sm:$0xff] %vm2347_vm14, %v1981_v13  ;;  %v1997_v23 = vmax.f32 %v1983_v17, %v578_v62  ;;  %vm2376_vm14 = vmmov %vm2335_vm0 }
 0x1c1   :  { %v580_v21 = vpop.xlane.xlu1 %579 }
 0x1c2   :  { %v2000_v49 = vmax.f32 %v1985_v9, %v580_v21  ;;  %745 = vperm.xlu1 %1194, %v1959_v18   ;;  %909 = vst.msk [vmem:[#allocation2 + $0x20] sm:$0xff] %vm2348_vm13, %v1997_v23  ;;  %vm2377_vm13 = vmmov %vm2335_vm0 }
 0x1c3   :  { %v594_v62 = vpop.xlane.xlu0 %593 }
 0x1c4   :  { %910 = vst.msk [vmem:[#allocation2 + $0x28] sm:$0xff] %vm2349_vm6, %v2000_v49  ;;  %v2016_v26 = vmax.f32 %v2002_v35, %v594_v62  ;;  %v2352_v62 = vsel %vm2351_vm1, %v1561_v53, 0.0  ;;  %v2359_v53 = vsel %vm2358_vm5, %v1696_v20, 0.0  ;;  %v2370_v20 = vsel %vm2369_vm2, %v1563_v54, 0.0  ;;  %vm2378_vm6 = vmmov %vm2335_vm0 }
 0x1c5   :  { %v596_v21 = vpop.xlane.xlu1 %595  ;;  %vm2380_vm1 = vmmov %vm2335_vm0 }
 0x1c6   :  { %v2019_v0 = vmax.f32 %v2004_v39, %v596_v21  ;;  %735 = vperm.xlu1 %1194, %v1997_v23   ;;  %v645_v41 = vsub.f32 %v2002_v35, %v2016_v26  ;;  %917 = vst.msk [vmem:[#allocation2 + $0x60] sm:$0xff] %vm2350_vm15, %v2016_v26  ;;  %v2353_v21 = vsel %vm1713_vm10, %v1765_v36, 0.0  ;;  %vm2360_vm10 = vnez %v2259_v63  ;;  %vm2379_vm15 = vmmov %vm2335_vm0 }
 0x1c7   :  { %v2361_v16 = vsel %vm2360_vm10, %v1653_v11, 0.0  ;;  %v2367_v63 = vsel %vm2366_vm8, %v1655_v12, 0.0  ;;  %v2368_v11 = vsel %vm1796_vm11, %v1819_v2, 0.0  ;;  %vm2375_vm11 = vmmov %vm2335_vm0 }
 0x1c8   :  { %v646_v27 = vsub.f32 %v2004_v39, %v2019_v0  ;;  %918 = vst.msk [vmem:[#allocation2 + $0x68] sm:$0xff] %vm2335_vm0, %v2019_v0  ;;  %vm2383_vm5 = vmmov %vm2335_vm0 }
 0x1c9   :  { %vm2384_vm10 = vmmov %vm2335_vm0 }
 0x1ca   :  { %775 = vperm.xlu1 %1194, %v2016_v26   ;;  %vm2386_vm8 = vmmov %vm2335_vm0 }
 0x1cb   :  { %vm2387_vm2 = vmmov %vm2335_vm0 }
 0x1cd   :  { %453 = vadd.xlane.f32.xlu0 %v1638_v8  ;;  %v2355_v8 = vsel %vm2354_vm9, %v1725_v28, 0.0  ;;  %vm2381_vm9 = vmmov %vm2335_vm0 }
 0x1ce   :  { %750 = vperm.xlu1 %1194, %v1962_v43  }
 0x1d1   :  { %457 = vadd.xlane.f32.xlu0 %v2352_v62 }
 0x1d2   :  { %740 = vperm.xlu1 %1194, %v2000_v49  }
 0x1d5   :  { %461 = vadd.xlane.f32.xlu0 %v2353_v21 }
 0x1d6   :  { %785 = vperm.xlu1 %1194, %v1978_v5  }
 0x1d9   :  { %465 = vadd.xlane.f32.xlu0 %v2355_v8 }
 0x1dd   :  { %469 = vadd.xlane.f32.xlu0 %v2357_v45 }
 0x1f3   :  { %760 = vperm.xlu0 %1195, %v1940_v48  }
 0x1f7   :  { %770 = vperm.xlu0 %1195, %v1926_v34  }
 0x1fa   :  { %455 = vadd.xlane.f32.xlu1 %v2359_v53 }
 0x1fb   :  { %790 = vperm.xlu0 %1195, %v1981_v13  }
 0x1fe   :  { %459 = vadd.xlane.f32.xlu1 %v2361_v16 }
 0x1ff   :  { %780 = vperm.xlu0 %1195, %v2019_v0   ;;  %v688_v0 = vld [vmem:[#allocation3 + $0x38] sm:$0xff] }
 0x202   :  { %463 = vadd.xlane.f32.xlu1 %v2362_v52 }
 0x206   :  { %467 = vadd.xlane.f32.xlu1 %v2363_v59 }
 0x20a   :  { %471 = vadd.xlane.f32.xlu1 %v2365_v1 }
 0x20e   :  { %475 = vadd.xlane.f32.xlu1 %v2367_v63 }
 0x212   :  { %479 = vadd.xlane.f32.xlu1 %v2368_v11 }
 0x216   :  { %483 = vadd.xlane.f32.xlu1 %v1813_v57 }
 0x21e   :  { %473 = vadd.xlane.f32.xlu0 %v2370_v20 }
 0x222   :  { %477 = vadd.xlane.f32.xlu0 %v2371_v10  ;;  %v421_v10 = vld [vmem:[#allocation4] sm:$0xff] }
 0x225   :  { %v726_v12 = vpop.permute.xlu1 %725 }
 0x226   :  { %481 = vadd.xlane.f32.xlu0 %v2373_v7  ;;  %v795_v37 = vsub.f32 %v1589_v61, %v726_v12 }
 0x228   :  { %v813_v42 = vmul.f32 1.442695, %v795_v37 }
 0x229   :  { %v716_v19 = vpop.permute.xlu0 %715 }
 0x22a   :  { %v793_v25 = vsub.f32 %v1671_v14, %v716_v19 }
 0x22c   :  { %v809_v28 = vmul.f32 1.442695, %v793_v25 }
 0x22d   :  { %v756_v36 = vpop.permute.xlu1 %755 }
 0x22e   :  { %1212 = vpow2.f32 %v809_v28  ;;  %v801_v44 = vsub.f32 %v1742_v31, %v756_v36 }
 0x230   :  { %v825_v58 = vmul.f32 1.442695, %v801_v44 }
 0x231   :  { %v731_v50 = vpop.permute.xlu1 %730 }
 0x232   :  { %v796_v54 = vsub.f32 %v1676_v15, %v731_v50  ;;  %v425_v50 = vld [vmem:[#allocation4 + $0x20] sm:$0xff] }
 0x234   :  { %v815_v38 = vmul.f32 1.442695, %v796_v54 }
 0x235   :  { %v721_v30 = vpop.permute.xlu1 %720 }
 0x236   :  { %1214 = vpow2.f32 %v815_v38  ;;  %v794_v24 = vsub.f32 %v1808_v47, %v721_v30  ;;  %v427_v30 = vld [vmem:[#allocation4 + $0x30] sm:$0xff] }
 0x238   :  { %v811_v40 = vmul.f32 1.442695, %v794_v24 }
 0x239   :  { %v766_v29 = vpop.permute.xlu1 %765 }
 0x23a   :  { %1216 = vpow2.f32 %v811_v40  ;;  %v803_v15 = vsub.f32 %v1584_v60, %v766_v29  ;;  %v429_v29 = vld [vmem:[#allocation4 + $0x40] sm:$0xff] }
 0x23b   :  { %v1213_v14 = vpop.eup %1212  ;;  %1218 = vpow2.f32 %v813_v42 }
 0x23c   :  { %841 = vadd.xlane.f32.xlu1 %v1213_v14  ;;  %1220 = vpow2.f32 %v825_v58  ;;  %v829_v62 = vmul.f32 1.442695, %v803_v15 }
 0x23d   :  { %v746_v57 = vpop.permute.xlu1 %745 }
 0x23e   :  { %v799_v61 = vsub.f32 %v1824_v3, %v746_v57  ;;  %1222 = vpow2.f32 %v829_v62 }
 0x240   :  { %v821_v8 = vmul.f32 1.442695, %v799_v61 }
 0x241   :  { %v736_v2 = vpop.permute.xlu1 %735 }
 0x242   :  { %v797_v31 = vsub.f32 %v1861_v55, %v736_v2  ;;  %1224 = vpow2.f32 %v821_v8 }
 0x243   :  { %v1215_v21 = vpop.eup %1214 }
 0x244   :  { %847 = vadd.xlane.f32.xlu1 %v1215_v21  ;;  %v817_v16 = vmul.f32 1.442695, %v797_v31 }
 0x245   :  { %v776_v47 = vpop.permute.xlu1 %775 }
 0x246   :  { %v805_v52 = vsub.f32 %v1873_v56, %v776_v47  ;;  %1226 = vpow2.f32 %v817_v16  ;;  %v423_v56 = vld [vmem:[#allocation4 + $0x10] sm:$0xff] }
 0x247   :  { %v1217_v45 = vpop.eup %1216 }
 0x248   :  { %843 = vadd.xlane.f32.xlu0 %v1217_v45  ;;  %v1219_v60 = vpop.eup %1218  ;;  %v833_v1 = vmul.f32 1.442695, %v805_v52  ;;  %v422_v52 = vld [vmem:[#allocation4 + $0x8] sm:$0xff] }
 0x249   :  { %v751_v53 = vpop.permute.xlu1 %750  ;;  %v1221_v3 = vpop.eup %1220 }
 0x24a   :  { %1228 = vpow2.f32 %v833_v1  ;;  %v800_v61 = vsub.f32 %v1833_v4, %v751_v53  ;;  %v424_v4 = vld [vmem:[#allocation4 + $0x18] sm:$0xff] }
 0x24b   :  { %v1223_v20 = vpop.eup %1222 }
 0x24c   :  { %845 = vadd.xlane.f32.xlu0 %v1219_v60  ;;  %v823_v47 = vmul.f32 1.442695, %v800_v61  ;;  %v2388_v61 = vld [vmem:[#allocation15_spill] sm:$0xff] }
 0x24d   :  { %v741_v59 = vpop.permute.xlu1 %740 }
 0x24e   :  { %v798_v8 = vsub.f32 %v1866_v22, %v741_v59 }
 0x24f   :  { %v1225_v12 = vpop.eup %1224 }
 0x250   :  { %857 = vadd.xlane.f32.xlu0 %v1221_v3  ;;  %v819_v45 = vmul.f32 1.442695, %v798_v8 }
 0x251   :  { %v786_v63 = vpop.permute.xlu1 %785 }
 0x252   :  { %v807_v11 = vsub.f32 %v1848_v51, %v786_v63 }
 0x253   :  { %v1227_v28 = vpop.eup %1226 }
 0x254   :  { %v837_v55 = vmul.f32 1.442695, %v807_v11  ;;  %861 = vadd.xlane.f32.xlu0 %v1223_v20  ;;  %v426_v11 = vld [vmem:[#allocation4 + $0x28] sm:$0xff] }
 0x256   :  { %1230 = vpow2.f32 %v837_v55  ;;  %v454_v7 = vpop.xlane.xlu0 %453  ;;  %v428_v55 = vld [vmem:[#allocation4 + $0x38] sm:$0xff] }
 0x257   :  { %v485_v19 = vadd.f32 %v454_v7, %v421_v10  ;;  %v1229_v54 = vpop.eup %1228 }
 0x258   :  { %853 = vadd.xlane.f32.xlu0 %v1225_v12 }
 0x259   :  { %502 = vst.msk [vmem:[#allocation4] sm:$0xff] %vm2374_vm12, %v485_v19  ;;  %v430_v19 = vld [vmem:[#allocation4 + $0x48] sm:$0xff]  ;;  %vm2407_vm12 = vmmov %vm2335_vm0 }
 0x25a   :  { %v458_v25 = vpop.xlane.xlu0 %457 }
 0x25b   :  { %v487_v36 = vadd.f32 %v458_v25, %v423_v56 }
 0x25c   :  { %849 = vadd.xlane.f32.xlu0 %v1227_v28 }
 0x25d   :  { %504 = vst.msk [vmem:[#allocation4 + $0x10] sm:$0xff] %vm2375_vm11, %v487_v36  ;;  %v432_v36 = vld [vmem:[#allocation4 + $0x58] sm:$0xff]  ;;  %vm2411_vm11 = vmmov %vm2335_vm0 }
 0x25e   :  { %v462_v51 = vpop.xlane.xlu0 %461 }
 0x25f   :  { %v489_v38 = vadd.f32 %v462_v51, %v425_v50 }
 0x260   :  { %865 = vadd.xlane.f32.xlu0 %v1229_v54 }
 0x261   :  { %506 = vst.msk [vmem:[#allocation4 + $0x20] sm:$0xff] %vm2376_vm14, %v489_v38  ;;  %v434_v38 = vld [vmem:[#allocation4 + $0x68] sm:$0xff]  ;;  %vm2412_vm14 = vmmov %vm2335_vm0 }
 0x262   :  { %v466_v37 = vpop.xlane.xlu0 %465 }
 0x263   :  { %v1231_v24 = vpop.eup %1230  ;;  %v491_v40 = vadd.f32 %v466_v37, %v427_v30 }
 0x264   :  { %869 = vadd.xlane.f32.xlu0 %v1231_v24  ;;  %v436_v24 = vld [vmem:[#allocation4 + $0x78] sm:$0xff] }
 0x265   :  { %508 = vst.msk [vmem:[#allocation4 + $0x30] sm:$0xff] %vm2377_vm13, %v491_v40  ;;  %vm2415_vm13 = vmmov %vm2335_vm0 }
 0x266   :  { %v470_v42 = vpop.xlane.xlu0 %469 }
 0x267   :  { %v493_v44 = vadd.f32 %v470_v42, %v429_v29  ;;  %v431_v42 = vld [vmem:[#allocation4 + $0x50] sm:$0xff] }
 0x269   :  { %510 = vst.msk [vmem:[#allocation4 + $0x40] sm:$0xff] %vm2378_vm6, %v493_v44  ;;  %vm2416_vm6 = vmmov %vm2335_vm0 }
 0x26e   :  { %v761_v14 = vpop.permute.xlu0 %760 }
 0x26f   :  { %v802_v58 = vsub.f32 %v1803_v46, %v761_v14 }
 0x271   :  { %v827_v21 = vmul.f32 1.442695, %v802_v58 }
 0x272   :  { %v771_v57 = vpop.permute.xlu0 %770 }
 0x273   :  { %v804_v15 = vsub.f32 %v1747_v32, %v771_v57  ;;  %v433_v57 = vld [vmem:[#allocation4 + $0x60] sm:$0xff] }
 0x275   :  { %v831_v2 = vmul.f32 1.442695, %v804_v15 }
 0x276   :  { %v791_v62 = vpop.permute.xlu0 %790 }
 0x277   :  { %1232 = vpow2.f32 %v831_v2  ;;  %v808_v46 = vsub.f32 %v1852_v33, %v791_v62  ;;  %v435_v2 = vld [vmem:[#allocation4 + $0x70] sm:$0xff] }
 0x278   :  { %1234 = vpow2.f32 %v827_v21  ;;  %v2389_v21 = vld [vmem:[#allocation17_spill] sm:$0xff] }
 0x279   :  { %1236 = vpow2.f32 %v823_v47  ;;  %v839_v53 = vmul.f32 1.442695, %v808_v46  ;;  %v2390_v47 = vsub.f32 %v2388_v61, %v2389_v21 }
 0x27a   :  { %v781_v31 = vpop.permute.xlu0 %780  ;;  %1238 = vpow2.f32 %v819_v45  ;;  %v2392_v45 = vld [vmem:[#allocation16_spill] sm:$0xff] }
 0x27b   :  { %v806_v16 = vsub.f32 %v1876_v6, %v781_v31  ;;  %v649_v8 = vmul.f32 1.442695, %v2390_v47 }
 0x27d   :  { %v835_v32 = vmul.f32 1.442695, %v806_v16  ;;  %v2393_v16 = vld [vmem:[#allocation18_spill] sm:$0xff] }
 0x27f   :  { %1240 = vpow2.f32 %v835_v32  ;;  %v2395_v32 = vld [vmem:[#allocation23_spill] sm:$0xff] }
 0x280   :  { %1242 = vpow2.f32 %v839_v53  ;;  %v2399_v53 = vld [vmem:[#allocation14_spill] sm:$0xff] }
 0x281   :  { %1244 = vpow2.f32 %v649_v8  ;;  %v2413_v8 = vld [vmem:[#allocation27_spill] sm:$0xff] }
 0x283   :  { %v456_v60 = vpop.xlane.xlu1 %455 }
 0x284   :  { %v1233_v1 = vpop.eup %1232  ;;  %v486_v3 = vadd.f32 %v456_v60, %v422_v52  ;;  %v2394_v52 = vsub.f32 %v2392_v45, %v2393_v16  ;;  %v2396_v60 = vld [vmem:[#allocation24_spill] sm:$0xff] }
 0x285   :  { %863 = vadd.xlane.f32.xlu1 %v1233_v1  ;;  %v1235_v59 = vpop.eup %1234  ;;  %v2397_v1 = vsub.f32 %v2395_v32, %v2396_v60  ;;  %v691_v32 = vld [vmem:[#allocation3 + $0x50] sm:$0xff] }
 0x286   :  { %503 = vst.msk [vmem:[#allocation4 + $0x8] sm:$0xff] %vm2379_vm15, %v486_v3  ;;  %v1237_v33 = vpop.eup %1236  ;;  %v655_v46 = vmul.f32 1.442695, %v2394_v52  ;;  %vm2417_vm15 = vmmov %vm2335_vm0 }
 0x287   :  { %v460_v22 = vpop.xlane.xlu1 %459  ;;  %v1239_v7 = vpop.eup %1238  ;;  %v651_v3 = vmul.f32 1.442695, %v2397_v1 }
 0x288   :  { %v488_v63 = vadd.f32 %v460_v22, %v424_v4  ;;  %1246 = vpow2.f32 %v655_v46  ;;  %v2398_v4 = vld [vmem:[#allocation12_spill] sm:$0xff] }
 0x289   :  { %859 = vadd.xlane.f32.xlu1 %v1235_v59  ;;  %v2400_v22 = vsub.f32 %v2398_v4, %v2399_v53  ;;  %1248 = vpow2.f32 %v651_v3  ;;  %v687_v4 = vld [vmem:[#allocation3 + $0x30] sm:$0xff] }
 0x28a   :  { %505 = vst.msk [vmem:[#allocation4 + $0x18] sm:$0xff] %vm2335_vm0, %v488_v63 }
 0x28b   :  { %v464_v6 = vpop.xlane.xlu1 %463  ;;  %v653_v59 = vmul.f32 1.442695, %v2400_v22  ;;  %v924_v22 = vld [vmem:[#allocation2] sm:$0xff] }
 0x28c   :  { %v490_v20 = vadd.f32 %v464_v6, %v426_v11  ;;  %v1241_v25 = vpop.eup %1240  ;;  %v681_v11 = vld [vmem:[#allocation3] sm:$0xff] }
 0x28d   :  { %855 = vadd.xlane.f32.xlu1 %v1237_v33  ;;  %v1243_v51 = vpop.eup %1242  ;;  %1250 = vpow2.f32 %v653_v59  ;;  %v2401_v6 = vld [vmem:[#allocation19_spill] sm:$0xff]  ;;  %v2402_v33 = vld [vmem:[#allocation21_spill] sm:$0xff] }
 0x28e   :  { %507 = vst.msk [vmem:[#allocation4 + $0x28] sm:$0xff] %vm2380_vm1, %v490_v20  ;;  %v1245_v63 = vpop.eup %1244  ;;  %v2403_v20 = vsub.f32 %v2401_v6, %v2402_v33  ;;  %v1004_v6 = vld [vmem:[#allocation4] sm:$0xff]  ;;  %vm2418_vm1 = vmmov %vm2335_vm0 }
 0x28f   :  { %v468_v10 = vpop.xlane.xlu1 %467 }
 0x290   :  { %v492_v12 = vadd.f32 %v468_v10, %v428_v55  ;;  %v665_v55 = vmul.f32 1.442695, %v2403_v20  ;;  %v697_v10 = vmul.f32 %v1245_v63, %v681_v11  ;;  %v685_v20 = vld [vmem:[#allocation3 + $0x20] sm:$0xff] }
 0x291   :  { %851 = vadd.xlane.f32.xlu1 %v1239_v7 }
 0x292   :  { %509 = vst.msk [vmem:[#allocation4 + $0x38] sm:$0xff] %vm2381_vm9, %v492_v12  ;;  %1252 = vpow2.f32 %v665_v55  ;;  %vm2419_vm9 = vmmov %vm2335_vm0 }
 0x293   :  { %v472_v56 = vpop.xlane.xlu1 %471 }
 0x294   :  { %v494_v28 = vadd.f32 %v472_v56, %v430_v19  ;;  %v2404_v19 = vld [vmem:[#allocation11_spill] sm:$0xff]  ;;  %v2405_v56 = vld [vmem:[#allocation13_spill] sm:$0xff] }
 0x295   :  { %867 = vadd.xlane.f32.xlu1 %v1241_v25  ;;  %v2406_v25 = vsub.f32 %v2404_v19, %v2405_v56  ;;  %v693_v56 = vld [vmem:[#allocation3 + $0x60] sm:$0xff] }
 0x296   :  { %511 = vst.msk [vmem:[#allocation4 + $0x48] sm:$0xff] %vm2382_vm3, %v494_v28  ;;  %vm2420_vm3 = vmmov %vm2335_vm0 }
 0x297   :  { %v476_v50 = vpop.xlane.xlu1 %475  ;;  %v669_v28 = vmul.f32 1.442695, %v2406_v25 }
 0x298   :  { %v496_v54 = vadd.f32 %v476_v50, %v432_v36  ;;  %v1247_v36 = vpop.eup %1246  ;;  %v684_v50 = vld [vmem:[#allocation3 + $0x18] sm:$0xff] }
 0x299   :  { %871 = vadd.xlane.f32.xlu1 %v1243_v51  ;;  %v2408_v51 = vld [vmem:[#allocation25_spill] sm:$0xff]  ;;  %1254 = vpow2.f32 %v669_v28 }
 0x29a   :  { %513 = vst.msk [vmem:[#allocation4 + $0x58] sm:$0xff] %vm2383_vm5, %v496_v54  ;;  %v2409_v54 = vsub.f32 %v2408_v51, %v1959_v18  ;;  %v683_v18 = vld [vmem:[#allocation3 + $0x10] sm:$0xff]  ;;  %vm2421_vm5 = vmmov %vm2335_vm0 }
 0x29b   :  { %v480_v30 = vpop.xlane.xlu1 %479 }
 0x29c   :  { %v498_v37 = vadd.f32 %v480_v30, %v434_v38  ;;  %v661_v38 = vmul.f32 1.442695, %v2409_v54  ;;  %v700_v30 = vmul.f32 %v1247_v36, %v684_v50  ;;  %v695_v54 = vld [vmem:[#allocation3 + $0x70] sm:$0xff] }
 0x29e   :  { %515 = vst.msk [vmem:[#allocation4 + $0x68] sm:$0xff] %vm2384_vm10, %v498_v37  ;;  %v1249_v37 = vpop.eup %1248  ;;  %1256 = vpow2.f32 %v661_v38  ;;  %vm2422_vm10 = vmmov %vm2335_vm0 }
 0x29f   :  { %v484_v40 = vpop.xlane.xlu1 %483 }
 0x2a0   :  { %v500_v29 = vadd.f32 %v484_v40, %v436_v24  ;;  %v682_v40 = vld [vmem:[#allocation3 + $0x8] sm:$0xff] }
 0x2a2   :  { %517 = vst.msk [vmem:[#allocation4 + $0x78] sm:$0xff] %vm2385_vm4, %v500_v29  ;;  %vm2431_vm4 = vmmov %vm2335_vm0 }
 0x2a7   :  { %v474_v44 = vpop.xlane.xlu0 %473 }
 0x2a8   :  { %v495_v14 = vadd.f32 %v474_v44, %v431_v42  ;;  %v2410_v44 = vsub.f32 %v1983_v17, %v1997_v23  ;;  %v689_v17 = vld [vmem:[#allocation3 + $0x40] sm:$0xff] }
 0x2aa   :  { %512 = vst.msk [vmem:[#allocation4 + $0x50] sm:$0xff] %vm2386_vm8, %v495_v14  ;;  %v657_v14 = vmul.f32 1.442695, %v2410_v44  ;;  %vm2432_vm8 = vmmov %vm2335_vm0 }
 0x2ab   :  { %v478_v58 = vpop.xlane.xlu0 %477 }
 0x2ac   :  { %v497_v15 = vadd.f32 %v478_v58, %v433_v57  ;;  %v698_v57 = vmul.f32 %v1249_v37, %v682_v40  ;;  %v1251_v58 = vpop.eup %1250  ;;  %v925_v37 = vld [vmem:[#allocation2 + $0x8] sm:$0xff] }
 0x2ad   :  { %v699_v61 = vmul.f32 %v1251_v58, %v683_v18  ;;  %v1253_v21 = vpop.eup %1252  ;;  %v2424_v18 = vld [vmem:[#allocation22_spill] sm:$0xff] }
 0x2ae   :  { %514 = vst.msk [vmem:[#allocation4 + $0x60] sm:$0xff] %vm2387_vm2, %v497_v15  ;;  %v705_v16 = vmul.f32 %v1253_v21, %v689_v17  ;;  %v1255_v52 = vpop.eup %1254  ;;  %v2428_v17 = vsub.f32 %v1985_v9, %v2000_v49  ;;  %vm2433_vm2 = vmmov %vm2335_vm0 }
 0x2af   :  { %v482_v62 = vpop.xlane.xlu0 %481  ;;  %v707_v60 = vmul.f32 %v1255_v52, %v691_v32  ;;  %v690_v32 = vld [vmem:[#allocation3 + $0x48] sm:$0xff] }
 0x2b0   :  { %v499_v31 = vadd.f32 %v482_v62, %v435_v2  ;;  %v673_v62 = vmul.f32 1.442695, %v645_v41  ;;  %v1257_v41 = vpop.eup %1256 }
 0x2b1   :  { %v703_v63 = vmul.f32 %v1257_v41, %v687_v4 }
 0x2b2   :  { %516 = vst.msk [vmem:[#allocation4 + $0x70] sm:$0xff] %vm2391_vm7, %v499_v31  ;;  %v2414_v31 = vsub.f32 %v2413_v8, %v1978_v5  ;;  %vm2434_vm7 = vmmov %vm2335_vm0 }
 0x2b4   :  { %v677_v45 = vmul.f32 1.442695, %v2414_v31  ;;  %v692_v31 = vld [vmem:[#allocation3 + $0x58] sm:$0xff] }
 0x2c5   :  { %v842_v7 = vpop.xlane.xlu1 %841 }
 0x2c6   :  { %v873_v12 = vadd.f32 %v842_v7, %v697_v10 }
 0x2c8   :  { %889 = vst.msk [vmem:[#allocation3] sm:$0xff] %vm2407_vm12, %v873_v12  ;;  %vm2435_vm12 = vmmov %vm2335_vm0 }
 0x2cd   :  { %v848_v24 = vpop.xlane.xlu1 %847 }
 0x2ce   :  { %v876_v29 = vadd.f32 %v848_v24, %v700_v30 }
 0x2cf   :  { %v940_v42 = vld [vmem:[#allocation3] sm:$0xff] }
 0x2d0   :  { %1258 = vlog2.f32 %v940_v42  ;;  %892 = vst.msk [vmem:[#allocation3 + $0x18] sm:$0xff] %vm2411_vm11, %v876_v29  ;;  %v1005_v29 = vld [vmem:[#allocation4 + $0x8] sm:$0xff]  ;;  %vm2436_vm11 = vmmov %vm2335_vm0 }
 0x2d1   :  { %v844_v15 = vpop.xlane.xlu0 %843  ;;  %1260 = vpow2.f32 %v657_v14 }
 0x2d2   :  { %v874_v2 = vadd.f32 %v844_v15, %v698_v57  ;;  %1262 = vpow2.f32 %v673_v62  ;;  %v2423_v57 = vld [vmem:[#allocation20_spill] sm:$0xff] }
 0x2d3   :  { %1264 = vpow2.f32 %v677_v45  ;;  %v644_v58 = vsub.f32 %v2423_v57, %v1926_v34  ;;  %v675_v34 = vmul.f32 1.442695, %v646_v27  ;;  %v2429_v45 = vld [vmem:[#allocation28_spill] sm:$0xff] }
 0x2d4   :  { %890 = vst.msk [vmem:[#allocation3 + $0x8] sm:$0xff] %vm2412_vm14, %v874_v2  ;;  %v2425_v2 = vsub.f32 %v2424_v18, %v1940_v48  ;;  %v2430_v48 = vsub.f32 %v2429_v45, %v1981_v13 }
 0x2d5   :  { %v846_v47 = vpop.xlane.xlu0 %845  ;;  %v671_v15 = vmul.f32 1.442695, %v644_v58 }
 0x2d6   :  { %v875_v23 = vadd.f32 %v846_v47, %v699_v61  ;;  %v667_v62 = vmul.f32 1.442695, %v2425_v2  ;;  %v2426_v61 = vld [vmem:[#allocation26_spill] sm:$0xff] }
 0x2d7   :  { %v2427_v21 = vsub.f32 %v2426_v61, %v1962_v43 }
 0x2d8   :  { %891 = vst.msk [vmem:[#allocation3 + $0x10] sm:$0xff] %vm2415_vm13, %v875_v23  ;;  %v659_v23 = vmul.f32 1.442695, %v2428_v17 }
 0x2d9   :  { %v858_v46 = vpop.xlane.xlu0 %857  ;;  %v663_v47 = vmul.f32 1.442695, %v2427_v21 }
 0x2da   :  { %v881_v26 = vadd.f32 %v858_v46, %v705_v16  ;;  %v679_v16 = vmul.f32 1.442695, %v2430_v48 }
 0x2db   :  { %v941_v35 = vld [vmem:[#allocation3 + $0x8] sm:$0xff] }
 0x2dc   :  { %1266 = vlog2.f32 %v941_v35  ;;  %897 = vst.msk [vmem:[#allocation3 + $0x40] sm:$0xff] %vm2416_vm6, %v881_v26 }
 0x2dd   :  { %v1259_v1 = vpop.eup %1258  ;;  %v862_v3 = vpop.xlane.xlu0 %861  ;;  %1268 = vpow2.f32 %v671_v15 }
 0x2de   :  { %v957_v5 = vmul.f32 0.6931472, %v1259_v1  ;;  %v883_v53 = vadd.f32 %v862_v3, %v707_v60  ;;  %v1261_v11 = vpop.eup %1260  ;;  %1270 = vpow2.f32 %v667_v62  ;;  %v686_v60 = vld [vmem:[#allocation3 + $0x28] sm:$0xff] }
 0x2df   :  { %v701_v7 = vmul.f32 %v1261_v11, %v685_v20  ;;  %v1263_v12 = vpop.eup %1262  ;;  %1272 = vpow2.f32 %v663_v47 }
 0x2e0   :  { %v988_v59 = vadd.f32 %v957_v5, %v924_v22  ;;  %899 = vst.msk [vmem:[#allocation3 + $0x50] sm:$0xff] %vm2417_vm15, %v883_v53  ;;  %v1265_v28 = vpop.eup %1264  ;;  %v709_v36 = vmul.f32 %v1263_v12, %v693_v56  ;;  %1274 = vpow2.f32 %v659_v23  ;;  %v694_v53 = vld [vmem:[#allocation3 + $0x68] sm:$0xff] }
 0x2e1   :  { %v854_v33 = vpop.xlane.xlu0 %853  ;;  %v711_v40 = vmul.f32 %v1265_v28, %v695_v54  ;;  %1276 = vpow2.f32 %v675_v34 }
 0x2e2   :  { %v1020_v55 = vsub.f32 %v1004_v6, %v988_v59  ;;  %v879_v10 = vadd.f32 %v854_v33, %v703_v63  ;;  %1278 = vpow2.f32 %v679_v16  ;;  %v696_v6 = vld [vmem:[#allocation3 + $0x78] sm:$0xff] }
 0x2e4   :  { %1085 = vst.msk [vmem:[%s2201_s2] sm:$0xff] %vm2335_vm0, %v1020_v55 }
 0x2e5   :  { %895 = vst.msk [vmem:[#allocation3 + $0x30] sm:$0xff] %vm2418_vm1, %v879_v10  ;;  %v850_v19 = vpop.xlane.xlu0 %849 }
 0x2e6   :  { %v877_v25 = vadd.f32 %v850_v19, %v701_v7 }
 0x2e8   :  { %893 = vst.msk [vmem:[#allocation3 + $0x20] sm:$0xff] %vm2419_vm9, %v877_v25 }
 0x2e9   :  { %v1267_v50 = vpop.eup %1266  ;;  %v866_v51 = vpop.xlane.xlu0 %865 }
 0x2ea   :  { %v959_v38 = vmul.f32 0.6931472, %v1267_v50  ;;  %v885_v30 = vadd.f32 %v866_v51, %v709_v36  ;;  %v1269_v8 = vpop.eup %1268 }
 0x2eb   :  { %v708_v52 = vmul.f32 %v1269_v8, %v692_v31  ;;  %v1271_v43 = vpop.eup %1270 }
 0x2ec   :  { %v989_v24 = vadd.f32 %v959_v38, %v925_v37  ;;  %901 = vst.msk [vmem:[#allocation3 + $0x60] sm:$0xff] %vm2420_vm3, %v885_v30  ;;  %v706_v9 = vmul.f32 %v1271_v43, %v690_v32  ;;  %v1273_v49 = vpop.eup %1272 }
 0x2ed   :  { %v870_v42 = vpop.xlane.xlu0 %869  ;;  %v704_v39 = vmul.f32 %v1273_v49, %v688_v0  ;;  %v1275_v41 = vpop.eup %1274 }
 0x2ee   :  { %v1021_v44 = vsub.f32 %v1005_v29, %v989_v24  ;;  %v887_v14 = vadd.f32 %v870_v42, %v711_v40  ;;  %v702_v3 = vmul.f32 %v1275_v41, %v686_v60  ;;  %v1277_v4 = vpop.eup %1276 }
 0x2ef   :  { %v710_v59 = vmul.f32 %v1277_v4, %v694_v53  ;;  %v1279_v63 = vpop.eup %1278 }
 0x2f0   :  { %1086 = vst.msk [vmem:[%s2201_s2 + $0x8] sm:$0xff] %vm2421_vm5, %v1021_v44  ;;  %v712_v20 = vmul.f32 %v1279_v63, %v696_v6 }
 0x2f1   :  { %903 = vst.msk [vmem:[#allocation3 + $0x70] sm:$0xff] %vm2422_vm10, %v887_v14 }
 0x30e   :  { %v864_v46 = vpop.xlane.xlu1 %863 }
 0x30f   :  { %v884_v26 = vadd.f32 %v864_v46, %v708_v52 }
 0x311   :  { %900 = vst.msk [vmem:[#allocation3 + $0x58] sm:$0xff] %vm2431_vm4, %v884_v26 }
 0x312   :  { %v860_v35 = vpop.xlane.xlu1 %859 }
 0x313   :  { %v882_v27 = vadd.f32 %v860_v35, %v706_v9 }
 0x315   :  { %898 = vst.msk [vmem:[#allocation3 + $0x48] sm:$0xff] %vm2432_vm8, %v882_v27 }
 0x316   :  { %v856_v13 = vpop.xlane.xlu1 %855 }
 0x317   :  { %v880_v1 = vadd.f32 %v856_v13, %v704_v39 }
 0x319   :  { %896 = vst.msk [vmem:[#allocation3 + $0x38] sm:$0xff] %vm2433_vm2, %v880_v1 }
 0x31a   :  { %v852_v5 = vpop.xlane.xlu1 %851 }
 0x31b   :  { %v878_v22 = vadd.f32 %v852_v5, %v702_v3 }
 0x31d   :  { %894 = vst.msk [vmem:[#allocation3 + $0x28] sm:$0xff] %vm2434_vm7, %v878_v22 }
 0x31e   :  { %v868_v11 = vpop.xlane.xlu1 %867 }
 0x31f   :  { %v886_v33 = vadd.f32 %v868_v11, %v710_v59 }
 0x321   :  { %902 = vst.msk [vmem:[#allocation3 + $0x68] sm:$0xff] %vm2435_vm12, %v886_v33 }
 0x322   :  { %v872_v55 = vpop.xlane.xlu1 %871 }
 0x323   :  { %v888_v10 = vadd.f32 %v872_v55, %v712_v20 }
 0x325   :  { %904 = vst.msk [vmem:[#allocation3 + $0x78] sm:$0xff] %vm2436_vm11, %v888_v10 }
 0x326   :  { %1105 = vsyncpa [#allocation6], 1 }
 0x327   :  { %1106 = vsyncpa [#allocation8], 1 }

</bundles_post_ra>
